<compile_context>
chip_gen: v5e
topology: v5e:2x2
jax: 0.10.0
libtpu: 0.0.40
codegen_flags: <defaults>
</compile_context>

<pallas_src>
import jax
import jax.numpy as jnp
from jax import lax
from jax.experimental import pallas as pl
from jax.experimental.pallas import tpu as pltpu


def encoder_gru_kernel(ids_ref, emb_ref, wih_ref, whh_ref, bx_ref, bhn_ref,
                       out_ref, gxr_s, gxz_s, gxn_s):
    """Single invocation: embedding + full GRU recurrence, everything in VMEM.

    ids_ref : (T, 1)      int32 token ids
    emb_ref : (V, E)      embedding table
    wih_ref : (3, E, H)   per-gate input weights (r, z, n), pre-transposed
    whh_ref : (3, H, H)   per-gate hidden weights (r, z, n), pre-transposed
    bx_ref  : (3, 1, H)   precombined biases: [b_ir+b_hr, b_iz+b_hz, b_in]
    bhn_ref : (1, H)      hidden bias of the n gate (stays inside r * (.))
    out_ref : (T, H)      per-step hidden states
    gx*_s   : (T, H)      VMEM scratch for the hoisted input-gate activations
    """
    T = out_ref.shape[0]
    H = out_ref.shape[-1]
    V = emb_ref.shape[0]

    # --- Embedding lookup, fused as a one-hot matmul on the MXU (exact). ---
    ids = ids_ref[...]                                            # (T, 1) int32
    vocab_iota = lax.broadcasted_iota(jnp.int32, (T, V), 1)       # (T, V)
    one_hot = (vocab_iota == ids).astype(jnp.float32)             # (T, V)
    x = jnp.dot(one_hot, emb_ref[...],
                preferred_element_type=jnp.float32)               # (T, E)

    # --- Hoisted non-recurrent matmuls: one M=T matmul per gate, biases folded.
    gxr_s[...] = jnp.dot(x, wih_ref[0], preferred_element_type=jnp.float32) + bx_ref[0]
    gxz_s[...] = jnp.dot(x, wih_ref[1], preferred_element_type=jnp.float32) + bx_ref[1]
    gxn_s[...] = jnp.dot(x, wih_ref[2], preferred_element_type=jnp.float32) + bx_ref[2]

    # Per-gate hidden weights + n-gate hidden bias, loaded once outside the loop.
    w_hr = whh_ref[0]
    w_hz = whh_ref[1]
    w_hn = whh_ref[2]
    b_hn = bhn_ref[...]                                           # (1, H)

    def step(t, h):
        # Recurrent path only: three (1,H)x(H,H) matmuls, all lane-aligned at 0.
        ghr = jnp.dot(h, w_hr, preferred_element_type=jnp.float32)
        ghz = jnp.dot(h, w_hz, preferred_element_type=jnp.float32)
        ghn = jnp.dot(h, w_hn, preferred_element_type=jnp.float32) + b_hn

        r = jax.nn.sigmoid(gxr_s[pl.ds(t, 1), :] + ghr)
        z = jax.nn.sigmoid(gxz_s[pl.ds(t, 1), :] + ghz)
        n = jnp.tanh(gxn_s[pl.ds(t, 1), :] + r * ghn)
        h_new = (1.0 - z) * n + z * h

        out_ref[pl.ds(t, 1), :] = h_new.astype(out_ref.dtype)     # resident VMEM block
        return h_new

    h0 = jnp.zeros((1, H), jnp.float32)
    lax.fori_loop(0, T, step, h0, unroll=True)


def encoder_forward(input_s, embedding_table, w_ih, w_hh, b_ih, b_hh):
    """input_s: (T,) int32 token ids. Returns (output (T,1,H), hidden (1,1,H)).

    Weights are in PyTorch GRU layout: w_ih (3H, E), w_hh (3H, H), b_* (3H,).
    """
    T = input_s.shape[0]
    V, E = embedding_table.shape
    H3 = w_ih.shape[0]
    H = H3 // 3

    ids2 = input_s.reshape(T, 1).astype(jnp.int32)
    emb = embedding_table.astype(jnp.float32)

    # Per-gate, pre-transposed weights: each gate's output lands at lane offset 0.
    w_ih_g = jnp.transpose(w_ih.reshape(3, H, E), (0, 2, 1)).astype(jnp.float32)  # (3, E, H)
    w_hh_g = jnp.transpose(w_hh.reshape(3, H, H), (0, 2, 1)).astype(jnp.float32)  # (3, H, H)

    b_ih3 = b_ih.reshape(3, 1, H).astype(jnp.float32)
    b_hh3 = b_hh.reshape(3, 1, H).astype(jnp.float32)
    # Fold r/z hidden biases into the precomputed gate bias; keep only the
    # n-gate hidden bias on the per-step path (it must sit inside r * (.)).
    b_x = jnp.concatenate([b_ih3[0:2] + b_hh3[0:2], b_ih3[2:3]], axis=0)          # (3, 1, H)
    b_hn = b_hh3[2]                                                               # (1, H)

    vmem = pl.BlockSpec(memory_space=pltpu.MemorySpace.VMEM)
    out = pl.pallas_call(
        encoder_gru_kernel,
        out_shape=jax.ShapeDtypeStruct((T, H), jnp.float32),
        in_specs=[vmem, vmem, vmem, vmem, vmem, vmem],
        out_specs=vmem,
        scratch_shapes=[
            pltpu.VMEM((T, H), jnp.float32),   # gx_r
            pltpu.VMEM((T, H), jnp.float32),   # gx_z
            pltpu.VMEM((T, H), jnp.float32),   # gx_n
        ],
    )(ids2, emb, w_ih_g, w_hh_g, b_x, b_hn)

    output = out.reshape(T, 1, H)
    hidden = output[-1:, :, :]       # (n_layers=1, 1, H) — final hidden state
    return output, hidden
    # TODO(synk): for very large vocabularies the embedding table would not fit
    # VMEM; in that case do the gather in the wrapper (jnp.take) and feed the
    # embedded (T, E) sequence to the kernel instead.


def _reference_gru(x, w_ih, w_hh, b_ih, b_hh):
    """Pure-JAX reference (PyTorch GRU semantics) for correctness checking."""
    T, B, E = x.shape
    H = w_hh.shape[1]
    h = jnp.zeros((B, H), jnp.float32)
    outs = []
    for t in range(T):
        xt = x[t]
        gx = xt @ w_ih.T + b_ih
        gh = h @ w_hh.T + b_hh
        r = jax.nn.sigmoid(gx[:, :H] + gh[:, :H])
        z = jax.nn.sigmoid(gx[:, H:2 * H] + gh[:, H:2 * H])
        n = jnp.tanh(gx[:, 2 * H:] + r * gh[:, 2 * H:])
        h = (1.0 - z) * n + z * h
        outs.append(h)
    out = jnp.stack(outs, axis=0)
    return out, out[-1:, :, :]


if __name__ == "__main__":
    # Small, deterministic config: vocab=50, embedding_size=32, hidden_size=32,
    # n_layers=1, rnn_type='GRU', dropout=0 (inactive), seq_len=8, batch=1.
    vocab_size, E, H, T = 50, 32, 32, 8

    key = jax.random.PRNGKey(0)
    k_emb, k_wih, k_whh, k_bih, k_bhh, k_ids = jax.random.split(key, 6)

    scale = 1.0 / jnp.sqrt(jnp.float32(H))
    embedding_table = jax.random.normal(k_emb, (vocab_size, E), jnp.float32) * 0.1
    w_ih = jax.random.uniform(k_wih, (3 * H, E), jnp.float32, -scale, scale)
    w_hh = jax.random.uniform(k_whh, (3 * H, H), jnp.float32, -scale, scale)
    b_ih = jax.random.uniform(k_bih, (3 * H,), jnp.float32, -scale, scale)
    b_hh = jax.random.uniform(k_bhh, (3 * H,), jnp.float32, -scale, scale)

    input_s = jax.random.randint(k_ids, (T,), 0, vocab_size, jnp.int32)

    output, hidden = encoder_forward(input_s, embedding_table, w_ih, w_hh, b_ih, b_hh)
    output = jax.block_until_ready(output)
    hidden = jax.block_until_ready(hidden)

    assert output.shape == (T, 1, H), output.shape
    assert hidden.shape == (1, 1, H), hidden.shape

    # Correctness check against a pure-JAX reference of the same math
    # (embedding gather done with jnp.take in the reference path).
    embedded = jnp.take(embedding_table, input_s, axis=0).reshape(T, 1, E)
    ref_out, ref_hid = _reference_gru(embedded, w_ih, w_hh, b_ih, b_hh)
    assert jnp.allclose(output, ref_out, atol=1e-5, rtol=1e-5)
    assert jnp.allclose(hidden, ref_hid, atol=1e-5, rtol=1e-5)

    print("KERNEL_OK")
</pallas_src>

<mosaic_0001>
module attributes {stable_mosaic.version = 11 : i64} {
  func.func @encoder_gru_kernel(%arg0: memref<8x1xi32, #tpu.memory_space<vmem>>, %arg1: memref<50x32xf32, #tpu.memory_space<vmem>>, %arg2: memref<3x32x32xf32, #tpu.memory_space<vmem>>, %arg3: memref<3x32x32xf32, #tpu.memory_space<vmem>>, %arg4: memref<3x1x32xf32, #tpu.memory_space<vmem>>, %arg5: memref<1x32xf32, #tpu.memory_space<vmem>>, %arg6: memref<8x32xf32, #tpu.memory_space<vmem>>, %arg7: memref<8x32xf32, #tpu.memory_space<vmem>>, %arg8: memref<8x32xf32, #tpu.memory_space<vmem>>, %arg9: memref<8x32xf32, #tpu.memory_space<vmem>>) attributes {dimension_semantics = [], scalar_prefetch = 0 : i64, scratch_operands = 3 : i64, tpu.core_type = #tpu.core_type<tc>} {
    %c0 = arith.constant 0 : index
    %c0_0 = arith.constant 0 : index
    %0 = vector.load %arg0[%c0, %c0_0] : memref<8x1xi32, #tpu.memory_space<vmem>>, vector<8x1xi32>
    %1 = tpu.iota {dimensions = array<i32: 1>} : vector<8x50xi32>
    %2 = vector.broadcast %0 : vector<8x1xi32> to vector<8x50xi32>
    %3 = arith.cmpi eq, %1, %2 : vector<8x50xi32>
    %4 = arith.extui %3 : vector<8x50xi1> to vector<8x50xi32>
    %5 = arith.sitofp %4 : vector<8x50xi32> to vector<8x50xf32>
    %c0_1 = arith.constant 0 : index
    %c0_2 = arith.constant 0 : index
    %6 = vector.load %arg1[%c0_1, %c0_2] : memref<50x32xf32, #tpu.memory_space<vmem>>, vector<50x32xf32>
    %cst = arith.constant dense<0.000000e+00> : vector<8x32xf32>
    %7 = tpu.matmul %5, %6, %cst {dimension_numbers = #tpu.dot_dimension_numbers<[1], [0], [0], [1], [0, 0, 1, 1], [], []>} : vector<8x50xf32>, vector<50x32xf32>, vector<8x32xf32> -> vector<8x32xf32>
    %c0_3 = arith.constant 0 : index
    %c0_4 = arith.constant 0 : index
    %c0_5 = arith.constant 0 : index
    %8 = vector.load %arg2[%c0_3, %c0_4, %c0_5] : memref<3x32x32xf32, #tpu.memory_space<vmem>>, vector<1x32x32xf32>
    %9 = vector.shape_cast %8 : vector<1x32x32xf32> to vector<32x32xf32>
    %cst_6 = arith.constant dense<0.000000e+00> : vector<8x32xf32>
    %10 = tpu.matmul %7, %9, %cst_6 {dimension_numbers = #tpu.dot_dimension_numbers<[1], [0], [0], [1], [0, 0, 1, 1], [], []>} : vector<8x32xf32>, vector<32x32xf32>, vector<8x32xf32> -> vector<8x32xf32>
    %c0_7 = arith.constant 0 : index
    %c0_8 = arith.constant 0 : index
    %c0_9 = arith.constant 0 : index
    %11 = vector.load %arg4[%c0_7, %c0_8, %c0_9] : memref<3x1x32xf32, #tpu.memory_space<vmem>>, vector<1x1x32xf32>
    %12 = vector.shape_cast %11 : vector<1x1x32xf32> to vector<1x32xf32>
    %13 = vector.broadcast %12 : vector<1x32xf32> to vector<8x32xf32>
    %14 = arith.addf %10, %13 : vector<8x32xf32>
    %c0_10 = arith.constant 0 : index
    %c0_11 = arith.constant 0 : index
    %15 = vector.load %arg7[%c0_10, %c0_11] : memref<8x32xf32, #tpu.memory_space<vmem>>, vector<8x32xf32>
    tpu.vector_store %arg7[%c0_10, %c0_11], %14 {strides = array<i32>} : memref<8x32xf32, #tpu.memory_space<vmem>>, vector<8x32xf32>,
    %c1 = arith.constant 1 : index
    %c0_12 = arith.constant 0 : index
    %c0_13 = arith.constant 0 : index
    %16 = vector.load %arg2[%c1, %c0_12, %c0_13] : memref<3x32x32xf32, #tpu.memory_space<vmem>>, vector<1x32x32xf32>
    %17 = vector.shape_cast %16 : vector<1x32x32xf32> to vector<32x32xf32>
    %cst_14 = arith.constant dense<0.000000e+00> : vector<8x32xf32>
    %18 = tpu.matmul %7, %17, %cst_14 {dimension_numbers = #tpu.dot_dimension_numbers<[1], [0], [0], [1], [0, 0, 1, 1], [], []>} : vector<8x32xf32>, vector<32x32xf32>, vector<8x32xf32> -> vector<8x32xf32>
    %c1_15 = arith.constant 1 : index
    %c0_16 = arith.constant 0 : index
    %c0_17 = arith.constant 0 : index
    %19 = vector.load %arg4[%c1_15, %c0_16, %c0_17] : memref<3x1x32xf32, #tpu.memory_space<vmem>>, vector<1x1x32xf32>
    %20 = vector.shape_cast %19 : vector<1x1x32xf32> to vector<1x32xf32>
    %21 = vector.broadcast %20 : vector<1x32xf32> to vector<8x32xf32>
    %22 = arith.addf %18, %21 : vector<8x32xf32>
    %c0_18 = arith.constant 0 : index
    %c0_19 = arith.constant 0 : index
    %23 = vector.load %arg8[%c0_18, %c0_19] : memref<8x32xf32, #tpu.memory_space<vmem>>, vector<8x32xf32>
    tpu.vector_store %arg8[%c0_18, %c0_19], %22 {strides = array<i32>} : memref<8x32xf32, #tpu.memory_space<vmem>>, vector<8x32xf32>,
    %c2 = arith.constant 2 : index
    %c0_20 = arith.constant 0 : index
    %c0_21 = arith.constant 0 : index
    %24 = vector.load %arg2[%c2, %c0_20, %c0_21] : memref<3x32x32xf32, #tpu.memory_space<vmem>>, vector<1x32x32xf32>
    %25 = vector.shape_cast %24 : vector<1x32x32xf32> to vector<32x32xf32>
    %cst_22 = arith.constant dense<0.000000e+00> : vector<8x32xf32>
    %26 = tpu.matmul %7, %25, %cst_22 {dimension_numbers = #tpu.dot_dimension_numbers<[1], [0], [0], [1], [0, 0, 1, 1], [], []>} : vector<8x32xf32>, vector<32x32xf32>, vector<8x32xf32> -> vector<8x32xf32>
    %c2_23 = arith.constant 2 : index
    %c0_24 = arith.constant 0 : index
    %c0_25 = arith.constant 0 : index
    %27 = vector.load %arg4[%c2_23, %c0_24, %c0_25] : memref<3x1x32xf32, #tpu.memory_space<vmem>>, vector<1x1x32xf32>
    %28 = vector.shape_cast %27 : vector<1x1x32xf32> to vector<1x32xf32>
    %29 = vector.broadcast %28 : vector<1x32xf32> to vector<8x32xf32>
    %30 = arith.addf %26, %29 : vector<8x32xf32>
    %c0_26 = arith.constant 0 : index
    %c0_27 = arith.constant 0 : index
    %31 = vector.load %arg9[%c0_26, %c0_27] : memref<8x32xf32, #tpu.memory_space<vmem>>, vector<8x32xf32>
    tpu.vector_store %arg9[%c0_26, %c0_27], %30 {strides = array<i32>} : memref<8x32xf32, #tpu.memory_space<vmem>>, vector<8x32xf32>,
    %c0_28 = arith.constant 0 : index
    %c0_29 = arith.constant 0 : index
    %c0_30 = arith.constant 0 : index
    %32 = vector.load %arg3[%c0_28, %c0_29, %c0_30] : memref<3x32x32xf32, #tpu.memory_space<vmem>>, vector<1x32x32xf32>
    %33 = vector.shape_cast %32 : vector<1x32x32xf32> to vector<32x32xf32>
    %c1_31 = arith.constant 1 : index
    %c0_32 = arith.constant 0 : index
    %c0_33 = arith.constant 0 : index
    %34 = vector.load %arg3[%c1_31, %c0_32, %c0_33] : memref<3x32x32xf32, #tpu.memory_space<vmem>>, vector<1x32x32xf32>
    %35 = vector.shape_cast %34 : vector<1x32x32xf32> to vector<32x32xf32>
    %c2_34 = arith.constant 2 : index
    %c0_35 = arith.constant 0 : index
    %c0_36 = arith.constant 0 : index
    %36 = vector.load %arg3[%c2_34, %c0_35, %c0_36] : memref<3x32x32xf32, #tpu.memory_space<vmem>>, vector<1x32x32xf32>
    %37 = vector.shape_cast %36 : vector<1x32x32xf32> to vector<32x32xf32>
    %c0_37 = arith.constant 0 : index
    %c0_38 = arith.constant 0 : index
    %38 = vector.load %arg5[%c0_37, %c0_38] : memref<1x32xf32, #tpu.memory_space<vmem>>, vector<1x32xf32>
    %cst_39 = arith.constant 0.000000e+00 : f32
    %39 = vector.broadcast %cst_39 : f32 to vector<1x32xf32>
    %c0_i32 = arith.constant 0 : i32
    %cst_40 = arith.constant dense<0.000000e+00> : vector<1x32xf32>
    %40 = tpu.matmul %39, %33, %cst_40 {dimension_numbers = #tpu.dot_dimension_numbers<[1], [0], [0], [1], [0, 0, 1, 1], [], []>} : vector<1x32xf32>, vector<32x32xf32>, vector<1x32xf32> -> vector<1x32xf32>
    %cst_41 = arith.constant dense<0.000000e+00> : vector<1x32xf32>
    %41 = tpu.matmul %39, %35, %cst_41 {dimension_numbers = #tpu.dot_dimension_numbers<[1], [0], [0], [1], [0, 0, 1, 1], [], []>} : vector<1x32xf32>, vector<32x32xf32>, vector<1x32xf32> -> vector<1x32xf32>
    %cst_42 = arith.constant dense<0.000000e+00> : vector<1x32xf32>
    %42 = tpu.matmul %39, %37, %cst_42 {dimension_numbers = #tpu.dot_dimension_numbers<[1], [0], [0], [1], [0, 0, 1, 1], [], []>} : vector<1x32xf32>, vector<32x32xf32>, vector<1x32xf32> -> vector<1x32xf32>
    %43 = arith.addf %42, %38 : vector<1x32xf32>
    %44 = arith.index_cast %c0_i32 : i32 to index
    %c0_43 = arith.constant 0 : index
    %45 = vector.load %arg7[%44, %c0_43] : memref<8x32xf32, #tpu.memory_space<vmem>>, vector<1x32xf32>
    %46 = arith.addf %45, %40 : vector<1x32xf32>
    %47 = arith.negf %46 : vector<1x32xf32>
    %48 = math.exp %47 : vector<1x32xf32>
    %cst_44 = arith.constant 1.000000e+00 : f32
    %49 = vector.broadcast %cst_44 : f32 to vector<1x32xf32>
    %50 = arith.addf %49, %48 : vector<1x32xf32>
    %51 = arith.divf %49, %50 : vector<1x32xf32>
    %52 = arith.index_cast %c0_i32 : i32 to index
    %c0_45 = arith.constant 0 : index
    %53 = vector.load %arg8[%52, %c0_45] : memref<8x32xf32, #tpu.memory_space<vmem>>, vector<1x32xf32>
    %54 = arith.addf %53, %41 : vector<1x32xf32>
    %55 = arith.negf %54 : vector<1x32xf32>
    %56 = math.exp %55 : vector<1x32xf32>
    %cst_46 = arith.constant 1.000000e+00 : f32
    %57 = vector.broadcast %cst_46 : f32 to vector<1x32xf32>
    %58 = arith.addf %57, %56 : vector<1x32xf32>
    %59 = arith.divf %57, %58 : vector<1x32xf32>
    %60 = arith.index_cast %c0_i32 : i32 to index
    %c0_47 = arith.constant 0 : index
    %61 = vector.load %arg9[%60, %c0_47] : memref<8x32xf32, #tpu.memory_space<vmem>>, vector<1x32xf32>
    %62 = arith.mulf %51, %43 : vector<1x32xf32>
    %63 = arith.addf %61, %62 : vector<1x32xf32>
    %64 = math.tanh %63 : vector<1x32xf32>
    %cst_48 = arith.constant 1.000000e+00 : f32
    %65 = vector.broadcast %cst_48 : f32 to vector<1x32xf32>
    %66 = arith.subf %65, %59 : vector<1x32xf32>
    %67 = arith.mulf %66, %64 : vector<1x32xf32>
    %68 = arith.mulf %59, %39 : vector<1x32xf32>
    %69 = arith.addf %67, %68 : vector<1x32xf32>
    %70 = arith.index_cast %c0_i32 : i32 to index
    %c0_49 = arith.constant 0 : index
    %71 = vector.load %arg6[%70, %c0_49] : memref<8x32xf32, #tpu.memory_space<vmem>>, vector<1x32xf32>
    tpu.vector_store %arg6[%70, %c0_49], %69 {strides = array<i32>} : memref<8x32xf32, #tpu.memory_space<vmem>>, vector<1x32xf32>,
    %c1_i32 = arith.constant 1 : i32
    %cst_50 = arith.constant dense<0.000000e+00> : vector<1x32xf32>
    %72 = tpu.matmul %69, %33, %cst_50 {dimension_numbers = #tpu.dot_dimension_numbers<[1], [0], [0], [1], [0, 0, 1, 1], [], []>} : vector<1x32xf32>, vector<32x32xf32>, vector<1x32xf32> -> vector<1x32xf32>
    %cst_51 = arith.constant dense<0.000000e+00> : vector<1x32xf32>
    %73 = tpu.matmul %69, %35, %cst_51 {dimension_numbers = #tpu.dot_dimension_numbers<[1], [0], [0], [1], [0, 0, 1, 1], [], []>} : vector<1x32xf32>, vector<32x32xf32>, vector<1x32xf32> -> vector<1x32xf32>
    %cst_52 = arith.constant dense<0.000000e+00> : vector<1x32xf32>
    %74 = tpu.matmul %69, %37, %cst_52 {dimension_numbers = #tpu.dot_dimension_numbers<[1], [0], [0], [1], [0, 0, 1, 1], [], []>} : vector<1x32xf32>, vector<32x32xf32>, vector<1x32xf32> -> vector<1x32xf32>
    %75 = arith.addf %74, %38 : vector<1x32xf32>
    %76 = arith.index_cast %c1_i32 : i32 to index
    %c0_53 = arith.constant 0 : index
    %77 = vector.load %arg7[%76, %c0_53] : memref<8x32xf32, #tpu.memory_space<vmem>>, vector<1x32xf32>
    %78 = arith.addf %77, %72 : vector<1x32xf32>
    %79 = arith.negf %78 : vector<1x32xf32>
    %80 = math.exp %79 : vector<1x32xf32>
    %cst_54 = arith.constant 1.000000e+00 : f32
    %81 = vector.broadcast %cst_54 : f32 to vector<1x32xf32>
    %82 = arith.addf %81, %80 : vector<1x32xf32>
    %83 = arith.divf %81, %82 : vector<1x32xf32>
    %84 = arith.index_cast %c1_i32 : i32 to index
    %c0_55 = arith.constant 0 : index
    %85 = vector.load %arg8[%84, %c0_55] : memref<8x32xf32, #tpu.memory_space<vmem>>, vector<1x32xf32>
    %86 = arith.addf %85, %73 : vector<1x32xf32>
    %87 = arith.negf %86 : vector<1x32xf32>
    %88 = math.exp %87 : vector<1x32xf32>
    %cst_56 = arith.constant 1.000000e+00 : f32
    %89 = vector.broadcast %cst_56 : f32 to vector<1x32xf32>
    %90 = arith.addf %89, %88 : vector<1x32xf32>
    %91 = arith.divf %89, %90 : vector<1x32xf32>
    %92 = arith.index_cast %c1_i32 : i32 to index
    %c0_57 = arith.constant 0 : index
    %93 = vector.load %arg9[%92, %c0_57] : memref<8x32xf32, #tpu.memory_space<vmem>>, vector<1x32xf32>
    %94 = arith.mulf %83, %75 : vector<1x32xf32>
    %95 = arith.addf %93, %94 : vector<1x32xf32>
    %96 = math.tanh %95 : vector<1x32xf32>
    %cst_58 = arith.constant 1.000000e+00 : f32
    %97 = vector.broadcast %cst_58 : f32 to vector<1x32xf32>
    %98 = arith.subf %97, %91 : vector<1x32xf32>
    %99 = arith.mulf %98, %96 : vector<1x32xf32>
    %100 = arith.mulf %91, %69 : vector<1x32xf32>
    %101 = arith.addf %99, %100 : vector<1x32xf32>
    %102 = arith.index_cast %c1_i32 : i32 to index
    %c0_59 = arith.constant 0 : index
    %103 = vector.load %arg6[%102, %c0_59] : memref<8x32xf32, #tpu.memory_space<vmem>>, vector<1x32xf32>
    tpu.vector_store %arg6[%102, %c0_59], %101 {strides = array<i32>} : memref<8x32xf32, #tpu.memory_space<vmem>>, vector<1x32xf32>,
    %c2_i32 = arith.constant 2 : i32
    %cst_60 = arith.constant dense<0.000000e+00> : vector<1x32xf32>
    %104 = tpu.matmul %101, %33, %cst_60 {dimension_numbers = #tpu.dot_dimension_numbers<[1], [0], [0], [1], [0, 0, 1, 1], [], []>} : vector<1x32xf32>, vector<32x32xf32>, vector<1x32xf32> -> vector<1x32xf32>
    %cst_61 = arith.constant dense<0.000000e+00> : vector<1x32xf32>
    %105 = tpu.matmul %101, %35, %cst_61 {dimension_numbers = #tpu.dot_dimension_numbers<[1], [0], [0], [1], [0, 0, 1, 1], [], []>} : vector<1x32xf32>, vector<32x32xf32>, vector<1x32xf32> -> vector<1x32xf32>
    %cst_62 = arith.constant dense<0.000000e+00> : vector<1x32xf32>
    %106 = tpu.matmul %101, %37, %cst_62 {dimension_numbers = #tpu.dot_dimension_numbers<[1], [0], [0], [1], [0, 0, 1, 1], [], []>} : vector<1x32xf32>, vector<32x32xf32>, vector<1x32xf32> -> vector<1x32xf32>
    %107 = arith.addf %106, %38 : vector<1x32xf32>
    %108 = arith.index_cast %c2_i32 : i32 to index
    %c0_63 = arith.constant 0 : index
    %109 = vector.load %arg7[%108, %c0_63] : memref<8x32xf32, #tpu.memory_space<vmem>>, vector<1x32xf32>
    %110 = arith.addf %109, %104 : vector<1x32xf32>
    %111 = arith.negf %110 : vector<1x32xf32>
    %112 = math.exp %111 : vector<1x32xf32>
    %cst_64 = arith.constant 1.000000e+00 : f32
    %113 = vector.broadcast %cst_64 : f32 to vector<1x32xf32>
    %114 = arith.addf %113, %112 : vector<1x32xf32>
    %115 = arith.divf %113, %114 : vector<1x32xf32>
    %116 = arith.index_cast %c2_i32 : i32 to index
    %c0_65 = arith.constant 0 : index
    %117 = vector.load %arg8[%116, %c0_65] : memref<8x32xf32, #tpu.memory_space<vmem>>, vector<1x32xf32>
    %118 = arith.addf %117, %105 : vector<1x32xf32>
    %119 = arith.negf %118 : vector<1x32xf32>
    %120 = math.exp %119 : vector<1x32xf32>
    %cst_66 = arith.constant 1.000000e+00 : f32
    %121 = vector.broadcast %cst_66 : f32 to vector<1x32xf32>
    %122 = arith.addf %121, %120 : vector<1x32xf32>
    %123 = arith.divf %121, %122 : vector<1x32xf32>
    %124 = arith.index_cast %c2_i32 : i32 to index
    %c0_67 = arith.constant 0 : index
    %125 = vector.load %arg9[%124, %c0_67] : memref<8x32xf32, #tpu.memory_space<vmem>>, vector<1x32xf32>
    %126 = arith.mulf %115, %107 : vector<1x32xf32>
    %127 = arith.addf %125, %126 : vector<1x32xf32>
    %128 = math.tanh %127 : vector<1x32xf32>
    %cst_68 = arith.constant 1.000000e+00 : f32
    %129 = vector.broadcast %cst_68 : f32 to vector<1x32xf32>
    %130 = arith.subf %129, %123 : vector<1x32xf32>
    %131 = arith.mulf %130, %128 : vector<1x32xf32>
    %132 = arith.mulf %123, %101 : vector<1x32xf32>
    %133 = arith.addf %131, %132 : vector<1x32xf32>
    %134 = arith.index_cast %c2_i32 : i32 to index
    %c0_69 = arith.constant 0 : index
    %135 = vector.load %arg6[%134, %c0_69] : memref<8x32xf32, #tpu.memory_space<vmem>>, vector<1x32xf32>
    tpu.vector_store %arg6[%134, %c0_69], %133 {strides = array<i32>} : memref<8x32xf32, #tpu.memory_space<vmem>>, vector<1x32xf32>,
    %c3_i32 = arith.constant 3 : i32
    %cst_70 = arith.constant dense<0.000000e+00> : vector<1x32xf32>
    %136 = tpu.matmul %133, %33, %cst_70 {dimension_numbers = #tpu.dot_dimension_numbers<[1], [0], [0], [1], [0, 0, 1, 1], [], []>} : vector<1x32xf32>, vector<32x32xf32>, vector<1x32xf32> -> vector<1x32xf32>
    %cst_71 = arith.constant dense<0.000000e+00> : vector<1x32xf32>
    %137 = tpu.matmul %133, %35, %cst_71 {dimension_numbers = #tpu.dot_dimension_numbers<[1], [0], [0], [1], [0, 0, 1, 1], [], []>} : vector<1x32xf32>, vector<32x32xf32>, vector<1x32xf32> -> vector<1x32xf32>
    %cst_72 = arith.constant dense<0.000000e+00> : vector<1x32xf32>
    %138 = tpu.matmul %133, %37, %cst_72 {dimension_numbers = #tpu.dot_dimension_numbers<[1], [0], [0], [1], [0, 0, 1, 1], [], []>} : vector<1x32xf32>, vector<32x32xf32>, vector<1x32xf32> -> vector<1x32xf32>
    %139 = arith.addf %138, %38 : vector<1x32xf32>
    %140 = arith.index_cast %c3_i32 : i32 to index
    %c0_73 = arith.constant 0 : index
    %141 = vector.load %arg7[%140, %c0_73] : memref<8x32xf32, #tpu.memory_space<vmem>>, vector<1x32xf32>
    %142 = arith.addf %141, %136 : vector<1x32xf32>
    %143 = arith.negf %142 : vector<1x32xf32>
    %144 = math.exp %143 : vector<1x32xf32>
    %cst_74 = arith.constant 1.000000e+00 : f32
    %145 = vector.broadcast %cst_74 : f32 to vector<1x32xf32>
    %146 = arith.addf %145, %144 : vector<1x32xf32>
    %147 = arith.divf %145, %146 : vector<1x32xf32>
    %148 = arith.index_cast %c3_i32 : i32 to index
    %c0_75 = arith.constant 0 : index
    %149 = vector.load %arg8[%148, %c0_75] : memref<8x32xf32, #tpu.memory_space<vmem>>, vector<1x32xf32>
    %150 = arith.addf %149, %137 : vector<1x32xf32>
    %151 = arith.negf %150 : vector<1x32xf32>
    %152 = math.exp %151 : vector<1x32xf32>
    %cst_76 = arith.constant 1.000000e+00 : f32
    %153 = vector.broadcast %cst_76 : f32 to vector<1x32xf32>
    %154 = arith.addf %153, %152 : vector<1x32xf32>
    %155 = arith.divf %153, %154 : vector<1x32xf32>
    %156 = arith.index_cast %c3_i32 : i32 to index
    %c0_77 = arith.constant 0 : index
    %157 = vector.load %arg9[%156, %c0_77] : memref<8x32xf32, #tpu.memory_space<vmem>>, vector<1x32xf32>
    %158 = arith.mulf %147, %139 : vector<1x32xf32>
    %159 = arith.addf %157, %158 : vector<1x32xf32>
    %160 = math.tanh %159 : vector<1x32xf32>
    %cst_78 = arith.constant 1.000000e+00 : f32
    %161 = vector.broadcast %cst_78 : f32 to vector<1x32xf32>
    %162 = arith.subf %161, %155 : vector<1x32xf32>
    %163 = arith.mulf %162, %160 : vector<1x32xf32>
    %164 = arith.mulf %155, %133 : vector<1x32xf32>
    %165 = arith.addf %163, %164 : vector<1x32xf32>
    %166 = arith.index_cast %c3_i32 : i32 to index
    %c0_79 = arith.constant 0 : index
    %167 = vector.load %arg6[%166, %c0_79] : memref<8x32xf32, #tpu.memory_space<vmem>>, vector<1x32xf32>
    tpu.vector_store %arg6[%166, %c0_79], %165 {strides = array<i32>} : memref<8x32xf32, #tpu.memory_space<vmem>>, vector<1x32xf32>,
    %c4_i32 = arith.constant 4 : i32
    %cst_80 = arith.constant dense<0.000000e+00> : vector<1x32xf32>
    %168 = tpu.matmul %165, %33, %cst_80 {dimension_numbers = #tpu.dot_dimension_numbers<[1], [0], [0], [1], [0, 0, 1, 1], [], []>} : vector<1x32xf32>, vector<32x32xf32>, vector<1x32xf32> -> vector<1x32xf32>
    %cst_81 = arith.constant dense<0.000000e+00> : vector<1x32xf32>
    %169 = tpu.matmul %165, %35, %cst_81 {dimension_numbers = #tpu.dot_dimension_numbers<[1], [0], [0], [1], [0, 0, 1, 1], [], []>} : vector<1x32xf32>, vector<32x32xf32>, vector<1x32xf32> -> vector<1x32xf32>
    %cst_82 = arith.constant dense<0.000000e+00> : vector<1x32xf32>
    %170 = tpu.matmul %165, %37, %cst_82 {dimension_numbers = #tpu.dot_dimension_numbers<[1], [0], [0], [1], [0, 0, 1, 1], [], []>} : vector<1x32xf32>, vector<32x32xf32>, vector<1x32xf32> -> vector<1x32xf32>
    %171 = arith.addf %170, %38 : vector<1x32xf32>
    %172 = arith.index_cast %c4_i32 : i32 to index
    %c0_83 = arith.constant 0 : index
    %173 = vector.load %arg7[%172, %c0_83] : memref<8x32xf32, #tpu.memory_space<vmem>>, vector<1x32xf32>
    %174 = arith.addf %173, %168 : vector<1x32xf32>
    %175 = arith.negf %174 : vector<1x32xf32>
    %176 = math.exp %175 : vector<1x32xf32>
    %cst_84 = arith.constant 1.000000e+00 : f32
    %177 = vector.broadcast %cst_84 : f32 to vector<1x32xf32>
    %178 = arith.addf %177, %176 : vector<1x32xf32>
    %179 = arith.divf %177, %178 : vector<1x32xf32>
    %180 = arith.index_cast %c4_i32 : i32 to index
    %c0_85 = arith.constant 0 : index
    %181 = vector.load %arg8[%180, %c0_85] : memref<8x32xf32, #tpu.memory_space<vmem>>, vector<1x32xf32>
    %182 = arith.addf %181, %169 : vector<1x32xf32>
    %183 = arith.negf %182 : vector<1x32xf32>
    %184 = math.exp %183 : vector<1x32xf32>
    %cst_86 = arith.constant 1.000000e+00 : f32
    %185 = vector.broadcast %cst_86 : f32 to vector<1x32xf32>
    %186 = arith.addf %185, %184 : vector<1x32xf32>
    %187 = arith.divf %185, %186 : vector<1x32xf32>
    %188 = arith.index_cast %c4_i32 : i32 to index
    %c0_87 = arith.constant 0 : index
    %189 = vector.load %arg9[%188, %c0_87] : memref<8x32xf32, #tpu.memory_space<vmem>>, vector<1x32xf32>
    %190 = arith.mulf %179, %171 : vector<1x32xf32>
    %191 = arith.addf %189, %190 : vector<1x32xf32>
    %192 = math.tanh %191 : vector<1x32xf32>
    %cst_88 = arith.constant 1.000000e+00 : f32
    %193 = vector.broadcast %cst_88 : f32 to vector<1x32xf32>
    %194 = arith.subf %193, %187 : vector<1x32xf32>
    %195 = arith.mulf %194, %192 : vector<1x32xf32>
    %196 = arith.mulf %187, %165 : vector<1x32xf32>
    %197 = arith.addf %195, %196 : vector<1x32xf32>
    %198 = arith.index_cast %c4_i32 : i32 to index
    %c0_89 = arith.constant 0 : index
    %199 = vector.load %arg6[%198, %c0_89] : memref<8x32xf32, #tpu.memory_space<vmem>>, vector<1x32xf32>
    tpu.vector_store %arg6[%198, %c0_89], %197 {strides = array<i32>} : memref<8x32xf32, #tpu.memory_space<vmem>>, vector<1x32xf32>,
    %c5_i32 = arith.constant 5 : i32
    %cst_90 = arith.constant dense<0.000000e+00> : vector<1x32xf32>
    %200 = tpu.matmul %197, %33, %cst_90 {dimension_numbers = #tpu.dot_dimension_numbers<[1], [0], [0], [1], [0, 0, 1, 1], [], []>} : vector<1x32xf32>, vector<32x32xf32>, vector<1x32xf32> -> vector<1x32xf32>
    %cst_91 = arith.constant dense<0.000000e+00> : vector<1x32xf32>
    %201 = tpu.matmul %197, %35, %cst_91 {dimension_numbers = #tpu.dot_dimension_numbers<[1], [0], [0], [1], [0, 0, 1, 1], [], []>} : vector<1x32xf32>, vector<32x32xf32>, vector<1x32xf32> -> vector<1x32xf32>
    %cst_92 = arith.constant dense<0.000000e+00> : vector<1x32xf32>
    %202 = tpu.matmul %197, %37, %cst_92 {dimension_numbers = #tpu.dot_dimension_numbers<[1], [0], [0], [1], [0, 0, 1, 1], [], []>} : vector<1x32xf32>, vector<32x32xf32>, vector<1x32xf32> -> vector<1x32xf32>
    %203 = arith.addf %202, %38 : vector<1x32xf32>
    %204 = arith.index_cast %c5_i32 : i32 to index
    %c0_93 = arith.constant 0 : index
    %205 = vector.load %arg7[%204, %c0_93] : memref<8x32xf32, #tpu.memory_space<vmem>>, vector<1x32xf32>
    %206 = arith.addf %205, %200 : vector<1x32xf32>
    %207 = arith.negf %206 : vector<1x32xf32>
    %208 = math.exp %207 : vector<1x32xf32>
    %cst_94 = arith.constant 1.000000e+00 : f32
    %209 = vector.broadcast %cst_94 : f32 to vector<1x32xf32>
    %210 = arith.addf %209, %208 : vector<1x32xf32>
    %211 = arith.divf %209, %210 : vector<1x32xf32>
    %212 = arith.index_cast %c5_i32 : i32 to index
    %c0_95 = arith.constant 0 : index
    %213 = vector.load %arg8[%212, %c0_95] : memref<8x32xf32, #tpu.memory_space<vmem>>, vector<1x32xf32>
    %214 = arith.addf %213, %201 : vector<1x32xf32>
    %215 = arith.negf %214 : vector<1x32xf32>
    %216 = math.exp %215 : vector<1x32xf32>
    %cst_96 = arith.constant 1.000000e+00 : f32
    %217 = vector.broadcast %cst_96 : f32 to vector<1x32xf32>
    %218 = arith.addf %217, %216 : vector<1x32xf32>
    %219 = arith.divf %217, %218 : vector<1x32xf32>
    %220 = arith.index_cast %c5_i32 : i32 to index
    %c0_97 = arith.constant 0 : index
    %221 = vector.load %arg9[%220, %c0_97] : memref<8x32xf32, #tpu.memory_space<vmem>>, vector<1x32xf32>
    %222 = arith.mulf %211, %203 : vector<1x32xf32>
    %223 = arith.addf %221, %222 : vector<1x32xf32>
    %224 = math.tanh %223 : vector<1x32xf32>
    %cst_98 = arith.constant 1.000000e+00 : f32
    %225 = vector.broadcast %cst_98 : f32 to vector<1x32xf32>
    %226 = arith.subf %225, %219 : vector<1x32xf32>
    %227 = arith.mulf %226, %224 : vector<1x32xf32>
    %228 = arith.mulf %219, %197 : vector<1x32xf32>
    %229 = arith.addf %227, %228 : vector<1x32xf32>
    %230 = arith.index_cast %c5_i32 : i32 to index
    %c0_99 = arith.constant 0 : index
    %231 = vector.load %arg6[%230, %c0_99] : memref<8x32xf32, #tpu.memory_space<vmem>>, vector<1x32xf32>
    tpu.vector_store %arg6[%230, %c0_99], %229 {strides = array<i32>} : memref<8x32xf32, #tpu.memory_space<vmem>>, vector<1x32xf32>,
    %c6_i32 = arith.constant 6 : i32
    %cst_100 = arith.constant dense<0.000000e+00> : vector<1x32xf32>
    %232 = tpu.matmul %229, %33, %cst_100 {dimension_numbers = #tpu.dot_dimension_numbers<[1], [0], [0], [1], [0, 0, 1, 1], [], []>} : vector<1x32xf32>, vector<32x32xf32>, vector<1x32xf32> -> vector<1x32xf32>
    %cst_101 = arith.constant dense<0.000000e+00> : vector<1x32xf32>
    %233 = tpu.matmul %229, %35, %cst_101 {dimension_numbers = #tpu.dot_dimension_numbers<[1], [0], [0], [1], [0, 0, 1, 1], [], []>} : vector<1x32xf32>, vector<32x32xf32>, vector<1x32xf32> -> vector<1x32xf32>
    %cst_102 = arith.constant dense<0.000000e+00> : vector<1x32xf32>
    %234 = tpu.matmul %229, %37, %cst_102 {dimension_numbers = #tpu.dot_dimension_numbers<[1], [0], [0], [1], [0, 0, 1, 1], [], []>} : vector<1x32xf32>, vector<32x32xf32>, vector<1x32xf32> -> vector<1x32xf32>
    %235 = arith.addf %234, %38 : vector<1x32xf32>
    %236 = arith.index_cast %c6_i32 : i32 to index
    %c0_103 = arith.constant 0 : index
    %237 = vector.load %arg7[%236, %c0_103] : memref<8x32xf32, #tpu.memory_space<vmem>>, vector<1x32xf32>
    %238 = arith.addf %237, %232 : vector<1x32xf32>
    %239 = arith.negf %238 : vector<1x32xf32>
    %240 = math.exp %239 : vector<1x32xf32>
    %cst_104 = arith.constant 1.000000e+00 : f32
    %241 = vector.broadcast %cst_104 : f32 to vector<1x32xf32>
    %242 = arith.addf %241, %240 : vector<1x32xf32>
    %243 = arith.divf %241, %242 : vector<1x32xf32>
    %244 = arith.index_cast %c6_i32 : i32 to index
    %c0_105 = arith.constant 0 : index
    %245 = vector.load %arg8[%244, %c0_105] : memref<8x32xf32, #tpu.memory_space<vmem>>, vector<1x32xf32>
    %246 = arith.addf %245, %233 : vector<1x32xf32>
    %247 = arith.negf %246 : vector<1x32xf32>
    %248 = math.exp %247 : vector<1x32xf32>
    %cst_106 = arith.constant 1.000000e+00 : f32
    %249 = vector.broadcast %cst_106 : f32 to vector<1x32xf32>
    %250 = arith.addf %249, %248 : vector<1x32xf32>
    %251 = arith.divf %249, %250 : vector<1x32xf32>
    %252 = arith.index_cast %c6_i32 : i32 to index
    %c0_107 = arith.constant 0 : index
    %253 = vector.load %arg9[%252, %c0_107] : memref<8x32xf32, #tpu.memory_space<vmem>>, vector<1x32xf32>
    %254 = arith.mulf %243, %235 : vector<1x32xf32>
    %255 = arith.addf %253, %254 : vector<1x32xf32>
    %256 = math.tanh %255 : vector<1x32xf32>
    %cst_108 = arith.constant 1.000000e+00 : f32
    %257 = vector.broadcast %cst_108 : f32 to vector<1x32xf32>
    %258 = arith.subf %257, %251 : vector<1x32xf32>
    %259 = arith.mulf %258, %256 : vector<1x32xf32>
    %260 = arith.mulf %251, %229 : vector<1x32xf32>
    %261 = arith.addf %259, %260 : vector<1x32xf32>
    %262 = arith.index_cast %c6_i32 : i32 to index
    %c0_109 = arith.constant 0 : index
    %263 = vector.load %arg6[%262, %c0_109] : memref<8x32xf32, #tpu.memory_space<vmem>>, vector<1x32xf32>
    tpu.vector_store %arg6[%262, %c0_109], %261 {strides = array<i32>} : memref<8x32xf32, #tpu.memory_space<vmem>>, vector<1x32xf32>,
    %c7_i32 = arith.constant 7 : i32
    %cst_110 = arith.constant dense<0.000000e+00> : vector<1x32xf32>
    %264 = tpu.matmul %261, %33, %cst_110 {dimension_numbers = #tpu.dot_dimension_numbers<[1], [0], [0], [1], [0, 0, 1, 1], [], []>} : vector<1x32xf32>, vector<32x32xf32>, vector<1x32xf32> -> vector<1x32xf32>
    %cst_111 = arith.constant dense<0.000000e+00> : vector<1x32xf32>
    %265 = tpu.matmul %261, %35, %cst_111 {dimension_numbers = #tpu.dot_dimension_numbers<[1], [0], [0], [1], [0, 0, 1, 1], [], []>} : vector<1x32xf32>, vector<32x32xf32>, vector<1x32xf32> -> vector<1x32xf32>
    %cst_112 = arith.constant dense<0.000000e+00> : vector<1x32xf32>
    %266 = tpu.matmul %261, %37, %cst_112 {dimension_numbers = #tpu.dot_dimension_numbers<[1], [0], [0], [1], [0, 0, 1, 1], [], []>} : vector<1x32xf32>, vector<32x32xf32>, vector<1x32xf32> -> vector<1x32xf32>
    %267 = arith.addf %266, %38 : vector<1x32xf32>
    %268 = arith.index_cast %c7_i32 : i32 to index
    %c0_113 = arith.constant 0 : index
    %269 = vector.load %arg7[%268, %c0_113] : memref<8x32xf32, #tpu.memory_space<vmem>>, vector<1x32xf32>
    %270 = arith.addf %269, %264 : vector<1x32xf32>
    %271 = arith.negf %270 : vector<1x32xf32>
    %272 = math.exp %271 : vector<1x32xf32>
    %cst_114 = arith.constant 1.000000e+00 : f32
    %273 = vector.broadcast %cst_114 : f32 to vector<1x32xf32>
    %274 = arith.addf %273, %272 : vector<1x32xf32>
    %275 = arith.divf %273, %274 : vector<1x32xf32>
    %276 = arith.index_cast %c7_i32 : i32 to index
    %c0_115 = arith.constant 0 : index
    %277 = vector.load %arg8[%276, %c0_115] : memref<8x32xf32, #tpu.memory_space<vmem>>, vector<1x32xf32>
    %278 = arith.addf %277, %265 : vector<1x32xf32>
    %279 = arith.negf %278 : vector<1x32xf32>
    %280 = math.exp %279 : vector<1x32xf32>
    %cst_116 = arith.constant 1.000000e+00 : f32
    %281 = vector.broadcast %cst_116 : f32 to vector<1x32xf32>
    %282 = arith.addf %281, %280 : vector<1x32xf32>
    %283 = arith.divf %281, %282 : vector<1x32xf32>
    %284 = arith.index_cast %c7_i32 : i32 to index
    %c0_117 = arith.constant 0 : index
    %285 = vector.load %arg9[%284, %c0_117] : memref<8x32xf32, #tpu.memory_space<vmem>>, vector<1x32xf32>
    %286 = arith.mulf %275, %267 : vector<1x32xf32>
    %287 = arith.addf %285, %286 : vector<1x32xf32>
    %288 = math.tanh %287 : vector<1x32xf32>
    %cst_118 = arith.constant 1.000000e+00 : f32
    %289 = vector.broadcast %cst_118 : f32 to vector<1x32xf32>
    %290 = arith.subf %289, %283 : vector<1x32xf32>
    %291 = arith.mulf %290, %288 : vector<1x32xf32>
    %292 = arith.mulf %283, %261 : vector<1x32xf32>
    %293 = arith.addf %291, %292 : vector<1x32xf32>
    %294 = arith.index_cast %c7_i32 : i32 to index
    %c0_119 = arith.constant 0 : index
    %295 = vector.load %arg6[%294, %c0_119] : memref<8x32xf32, #tpu.memory_space<vmem>>, vector<1x32xf32>
    tpu.vector_store %arg6[%294, %c0_119], %293 {strides = array<i32>} : memref<8x32xf32, #tpu.memory_space<vmem>>, vector<1x32xf32>,
    %c8_i32 = arith.constant 8 : i32
    return
  }
}

</mosaic_0001>

<bundles_post_ra>
// kernel: tpu_custom_call.1
= control target key start
LH: loop header
LB: loop body
LE: loop exit
PB: predicated region body
PF: predicated region fallthrough
CT: control target
= control target key end

     0   :  { %11 = vsyncpa [#allocation6], 0  ;;  %s1631_s0 = inlined_call_operand.vmem [shape: s32[8,1], index: 0, kind: input, shape index: {}]   ;;  %s1632_s1 = inlined_call_operand.vmem [shape: f32[50,32], index: 1, kind: input, shape index: {}]   ;;  %s1633_s2 = inlined_call_operand.vmem [shape: f32[3,32,32], index: 2, kind: input, shape index: {}]   ;;  %s1634_s3 = inlined_call_operand.hbm [shape: f32[3,32,32], index: 3, kind: input, shape index: {}]   ;;  %s1635_s4 = inlined_call_operand.vmem [shape: f32[3,1,32], index: 4, kind: input, shape index: {}]   ;;  %s1636_s5 = inlined_call_operand.vmem [shape: f32[1,32], index: 5, kind: input, shape index: {}]   ;;  %s1637_s6 = inlined_call_operand.hbm [shape: f32[8,32], index: 6, kind: output, shape index: {}]  }
   0x1   :  { %12 = vsyncpa [#allocation7], 0  ;;  %s23_s23 = sshll.u32 %s1634_s3, 4  ;;  %s1319_s24 = smov [#allocation5]   ;;  %s24_s23 = int_to_ptr.hbm [resolvable:$true] %s23_s23 }
   0x2   :  { %s25_s25 = sshll.u32 %s1319_s24, 4  ;;  %s1320_s26 = smov 128   ;;  %s26_s25 = int_to_ptr.vmem [resolvable:$true] %s25_s25 }
   0x3   :  { %s1321_s27 = smov 8  }
   0x4   :  { %31 = dma.hbm_to_vmem [thread:$0]  %s24_s23, 1536, %s26_s25, [#allocation6], %s1320_s26, %s1320_s26, %s1321_s27  }
   0x5   :  { %1315 = dma.done.wait [#allocation6], 1536  }
   0x6   :  { %1316 = vsyncadd [#allocation6], 4294965760  ;;  %v1322_v0 = vmov 0   ;;  %vm60_vm0 = vcmask 1041408   ;;  %v40_v1 = vld [vmem:[%s1631_s0] sm:$0xff]  ;;  %v54_v3 = vld [vmem:[%s1632_s1 + $0x28] sm:$0xff]  ;;  %v41_v18 = vlaneseq }
   0x7   :  { %1183 = vset.pattern.permute.xlu0 %v1322_v0  ;;  %v55_v2 = vld [vmem:[%s1632_s1 + $0x30] sm:$0x3]  ;;  %v53_v4 = vld [vmem:[%s1632_s1 + $0x20] sm:$0xff]  ;;  %v52_v5 = vld [vmem:[%s1632_s1 + $0x18] sm:$0xff]  ;;  %vm56_vm1 = vcmask 408576   ;;  %v1323_v21 = vmov 0.0  }
   0x8   :  { %44 = vperm.xlu0 %1183, %v40_v1   ;;  %1125 = vmatpush.msk.msra.mxu0 %vm60_vm0, %v55_v2  ;;  %v51_v6 = vld [vmem:[%s1632_s1 + $0x10] sm:$0xff]  ;;  %v50_v7 = vld [vmem:[%s1632_s1 + $0x8] sm:$0xff]  ;;  %v49_v8 = vld [vmem:[%s1632_s1] sm:$0xff]  ;;  %v42_v19 = vand.u32 127, %v41_v18  ;;  %vm92_vm3 = vcmask 261120   ;;  %vm307_vm12 = vcmask 253952  }
   0x9   :  { %v87_v9 = vld [vmem:[%s1633_s2 + $0x18] sm:$0xff]  ;;  %v86_v12 = vld [vmem:[%s1633_s2 + $0x10] sm:$0xff]  ;;  %v85_v15 = vld [vmem:[%s1633_s2 + $0x8] sm:$0xff]  ;;  %s1114_s24 = sshll.u32 %s1637_s6, 4  ;;  %s1115_s24 = int_to_ptr.hbm [resolvable:$true] %s1114_s24 }
   0xa   :  { %74 = vmatpush.msra.mxu0 %v54_v3  ;;  %v1131_v10 = vld [vmem:[%s1633_s2 + $0x38] sm:$0xff]  ;;  %108 = vmatpush.msra.mxu1 %v87_v9  ;;  %v1130_v13 = vld [vmem:[%s1633_s2 + $0x30] sm:$0xff]  ;;  %v1129_v16 = vld [vmem:[%s1633_s2 + $0x28] sm:$0xff] }
   0xb   :  { %v1137_v11 = vld [vmem:[%s1633_s2 + $0x58] sm:$0xff]  ;;  %139 = vmatpush.msra.mxu2 %v1131_v10  ;;  %v1136_v14 = vld [vmem:[%s1633_s2 + $0x50] sm:$0xff]  ;;  %v1135_v17 = vld [vmem:[%s1633_s2 + $0x48] sm:$0xff] }
   0xc   :  { %75 = vmatpush.msra.mxu0 %v53_v4  ;;  %170 = vmatpush.msra.mxu3 %v1137_v11  ;;  %v84_v23 = vld [vmem:[%s1633_s2] sm:$0xff]  ;;  %v1423_v26 = vld [vmem:[#allocation5 + $0x18] sm:$0xff]  ;;  %v1427_v28 = vld [vmem:[#allocation5 + $0x10] sm:$0xff] }
   0xd   :  { %109 = vmatpush.msra.mxu1 %v86_v12  ;;  %140 = vmatpush.msra.mxu2 %v1130_v13  ;;  %v1128_v24 = vld [vmem:[%s1633_s2 + $0x20] sm:$0xff]  ;;  %v1425_v27 = vld [vmem:[#allocation5 + $0x38] sm:$0xff]  ;;  %v1431_v29 = vld [vmem:[#allocation5 + $0x30] sm:$0xff] }
   0xe   :  { %76 = vmatpush.msra.mxu0 %v52_v5  ;;  %171 = vmatpush.msra.mxu3 %v1136_v14  ;;  %v1134_v25 = vld [vmem:[%s1633_s2 + $0x40] sm:$0xff]  ;;  %v1440_v32 = vld [vmem:[#allocation5] sm:$0xff]  ;;  %v1450_v34 = vld [vmem:[#allocation5 + $0x58] sm:$0xff] }
   0xf   :  { %110 = vmatpush.msra.mxu1 %v85_v15  ;;  %141 = vmatpush.msra.mxu2 %v1129_v16  ;;  %v1433_v30 = vld [vmem:[#allocation5 + $0x8] sm:$0xff]  ;;  %v1442_v33 = vld [vmem:[#allocation5 + $0x20] sm:$0xff]  ;;  %v1452_v35 = vld [vmem:[#allocation5 + $0x50] sm:$0xff] }
  0x10   :  { %77 = vmatpush.msra.mxu0 %v51_v6  ;;  %172 = vmatpush.msra.mxu3 %v1135_v17  ;;  %v1435_v31 = vld [vmem:[#allocation5 + $0x28] sm:$0xff]  ;;  %v1460_v37 = vld [vmem:[#allocation5 + $0x40] sm:$0xff] }
  0x11   :  { %111 = vmatpush.msra.mxu1 %v84_v23  ;;  %142 = vmatpush.msra.mxu2 %v1128_v24  ;;  %v1456_v36 = vld [vmem:[#allocation5 + $0x48] sm:$0xff] }
  0x12   :  { %78 = vmatpush.msra.mxu0 %v50_v7  ;;  %173 = vmatpush.msra.mxu3 %v1134_v25  ;;  %v1184_v39 = vld [vmem:[%s1635_s4] ss:$0 sm:$0xff]  ;;  %v1185_v42 = vld [vmem:[%s1635_s4 + $0x1] ss:$0 sm:$0xff]  ;;  %v1186_v43 = vld [vmem:[%s1635_s4 + $0x2] ss:$0 sm:$0xff] }
  0x13   :  { %209 = vmatpush.msrb.mxu1 %v1423_v26  ;;  %229 = vmatpush.msrb.mxu2 %v1425_v27  ;;  %v1509_v63 = vld [vmem:[%s1636_s5] sm:$0x1]  ;;  %s1324_s5 = smov [#allocation8]  }
  0x14   :  { %79 = vmatpush.msra.mxu0 %v49_v8  ;;  %249 = vmatpush.msrb.mxu3 %v1450_v34  ;;  %s1112_s21 = sshll.u32 %s1324_s5, 4  ;;  %s1113_s21 = int_to_ptr.vmem [resolvable:$true] %s1112_s21 }
  0x15   :  { %210 = vmatpush.msrb.mxu1 %v1427_v28  ;;  %230 = vmatpush.msrb.mxu2 %v1431_v29 }
  0x16   :  { %324 = vmatpush.msrb.mxu0 %v1423_v26  ;;  %250 = vmatpush.msrb.mxu3 %v1452_v35 }
  0x17   :  { %211 = vmatpush.msrb.mxu1 %v1433_v30  ;;  %231 = vmatpush.msrb.mxu2 %v1435_v31 }
  0x18   :  { %325 = vmatpush.msrb.mxu0 %v1427_v28  ;;  %251 = vmatpush.msrb.mxu3 %v1456_v36 }
  0x19   :  { %212 = vmatpush.msrb.mxu1 %v1440_v32  ;;  %232 = vmatpush.msrb.mxu2 %v1442_v33 }
  0x1a   :  { %326 = vmatpush.msrb.mxu0 %v1433_v30  ;;  %252 = vmatpush.msrb.mxu3 %v1460_v37 }
  0x1c   :  { %327 = vmatpush.msrb.mxu0 %v1440_v32 }
  0x7a   :  { %v45_v20 = vpop.permute.xlu0 %44 }
  0x7b   :  { %vm46_vm2 = vcmp.eq.s32.totalorder %v42_v19, %v45_v20 }
  0x7c   :  { %v1124_v22 = vsel %vm46_vm2, 1.0, %v1323_v21 }
  0x7d   :  { %1126 = vmatmul.msk.f32.vlgmr.msra.gmra.mxu0 %vm56_vm1, %v1124_v22 }
  0x7e   :  { %458 = vmatpush.msra.mxu0 %v1425_v27 }
  0x80   :  { %459 = vmatpush.msra.mxu0 %v1431_v29 }
  0x82   :  { %460 = vmatpush.msra.mxu0 %v1435_v31 }
  0x84   :  { %461 = vmatpush.msra.mxu0 %v1442_v33 }
  0xfa   :  { %v81_v38 = vpop.f32.mrf.mxu0 }
  0xfb   :  { %1127 = vmatmul.msk.f32.vlgmr.msra.gmra.mxu1 %vm92_vm3, %v81_v38  ;;  %1133 = vmatmul.msk.f32.vlgmr.msra.gmra.mxu2 %vm92_vm3, %v81_v38 }
  0xfc   :  { %1139 = vmatmul.msk.f32.vlgmr.msra.gmra.mxu3 %vm92_vm3, %v81_v38  ;;  %344 = vmatpush.msra.mxu1 %v1425_v27 }
  0xfd   :  { %364 = vmatpush.msra.mxu2 %v1450_v34  ;;  %438 = vmatpush.msra.mxu3 %v1423_v26 }
  0xfe   :  { %345 = vmatpush.msra.mxu1 %v1431_v29 }
  0xff   :  { %365 = vmatpush.msra.mxu2 %v1452_v35  ;;  %439 = vmatpush.msra.mxu3 %v1427_v28 }
 0x100   :  { %346 = vmatpush.msra.mxu1 %v1435_v31 }
 0x101   :  { %366 = vmatpush.msra.mxu2 %v1456_v36  ;;  %440 = vmatpush.msra.mxu3 %v1433_v30 }
 0x102   :  { %347 = vmatpush.msra.mxu1 %v1442_v33 }
 0x103   :  { %213 = vmatmul.f32.vlgmr.msrb.gmra.mxu1 %v1323_v21  ;;  %233 = vmatmul.f32.vlgmr.msrb.gmra.mxu2 %v1323_v21 }
 0x104   :  { %253 = vmatmul.f32.vlgmr.msrb.gmra.mxu3 %v1323_v21  ;;  %367 = vmatpush.msra.mxu2 %v1460_v37 }
 0x105   :  { %478 = vmatpush.msrb.mxu1 %v1450_v34  ;;  %441 = vmatpush.msra.mxu3 %v1440_v32 }
 0x106   :  { %552 = vmatpush.msrb.mxu2 %v1423_v26 }
 0x107   :  { %572 = vmatpush.msrb.mxu3 %v1425_v27  ;;  %479 = vmatpush.msrb.mxu1 %v1452_v35 }
 0x108   :  { %553 = vmatpush.msrb.mxu2 %v1427_v28 }
 0x109   :  { %573 = vmatpush.msrb.mxu3 %v1431_v29  ;;  %480 = vmatpush.msrb.mxu1 %v1456_v36 }
 0x10a   :  { %554 = vmatpush.msrb.mxu2 %v1433_v30 }
 0x10b   :  { %574 = vmatpush.msrb.mxu3 %v1435_v31  ;;  %481 = vmatpush.msrb.mxu1 %v1460_v37 }
 0x10c   :  { %555 = vmatpush.msrb.mxu2 %v1440_v32 }
 0x10d   :  { %575 = vmatpush.msrb.mxu3 %v1442_v33 }
 0x178   :  { %v113_v40 = vpop.f32.mrf.mxu1 }
 0x179   :  { %v114_v41 = vadd.f32 %v1184_v39, %v113_v40 }
 0x17b   :  { %116 = vst.msk [vmem:[#allocation2] sm:$0xff] %vm92_vm3, %v114_v41 }
 0x17e   :  { %v144_v44 = vpop.f32.mrf.mxu2 }
 0x17f   :  { %v145_v45 = vadd.f32 %v1185_v42, %v144_v44  ;;  %v175_v46 = vpop.f32.mrf.mxu3 }
 0x180   :  { %v176_v47 = vadd.f32 %v1186_v43, %v175_v46  ;;  %v214_v48 = vpop.f32.mrf.mxu1 }
 0x181   :  { %147 = vst.msk [vmem:[#allocation3] sm:$0xff] %vm92_vm3, %v145_v45 }
 0x182   :  { %178 = vst.msk [vmem:[#allocation4] sm:$0xff] %vm92_vm3, %v176_v47  ;;  %v257_v49 = vld [vmem:[#allocation2] sm:$0x1]  ;;  %v372_v40 = vld [vmem:[#allocation2 + $0x1] sm:$0x1] }
 0x183   :  { %v258_v50 = vadd.f32 %v257_v49, %v214_v48 }
 0x185   :  { %v1140_v51 = vmul.f32 -1.442695, %v258_v50 }
 0x186   :  { %v234_v52 = vpop.f32.mrf.mxu2 }
 0x187   :  { %1187 = vpow2.f32 %v1140_v51  ;;  %v254_v0 = vpop.f32.mrf.mxu3 }
 0x188   :  { %v278_v53 = vld [vmem:[#allocation3] sm:$0x1]  ;;  %v255_v6 = vadd.f32 %v254_v0, %v1509_v63  ;;  %v393_v42 = vld [vmem:[#allocation3 + $0x1] sm:$0x1] }
 0x189   :  { %v279_v54 = vadd.f32 %v278_v53, %v234_v52  ;;  %v299_v16 = vld [vmem:[#allocation4] sm:$0x1] }
 0x18b   :  { %v1141_v55 = vmul.f32 -1.442695, %v279_v54 }
 0x18d   :  { %v1188_v56 = vpop.eup %1187  ;;  %1189 = vpow2.f32 %v1141_v55 }
 0x18e   :  { %v262_v57 = vadd.f32 1.0, %v1188_v56 }
 0x190   :  { %1191 = vrcp.f32 %v262_v57  ;;  %v274_v1 = vand.u32 2147483648, %v262_v57  ;;  %v272_v3 = vand.u32 2147483647, %v262_v57  ;;  %vm268_vm5 = vweird.f32 %v262_v57 }
 0x192   :  { %v275_v8 = vor.u32 1.1754944e-38, %v274_v1  ;;  %vm273_vm7 = vcmp.eq.f32.partialorder %v272_v3, 8.507059e+37 }
 0x193   :  { %v1190_v58 = vpop.eup %1189 }
 0x194   :  { %v283_v59 = vadd.f32 1.0, %v1190_v58 }
 0x196   :  { %v1192_v60 = vpop.eup %1191  ;;  %1193 = vrcp.f32 %v283_v59  ;;  %v295_v13 = vand.u32 2147483648, %v283_v59  ;;  %v293_v15 = vand.u32 2147483647, %v283_v59  ;;  %vm289_vm9 = vweird.f32 %v283_v59 }
 0x197   :  { %v264_v61 = vmul.f32 %v1192_v60, %v262_v57  ;;  %vm269_vm4 = vweird.f32 %v1192_v60 }
 0x198   :  { %vm270_vm6 = vmor %vm268_vm5, %vm269_vm4  ;;  %v296_v19 = vor.u32 1.1754944e-38, %v295_v13  ;;  %vm294_vm11 = vcmp.eq.f32.partialorder %v293_v15, 8.507059e+37 }
 0x199   :  { %v265_v62 = vsub.f32 1.0, %v264_v61 }
 0x19b   :  { %v266_v2 = vmul.f32 %v1192_v60, %v265_v62 }
 0x19c   :  { %v1194_v4 = vpop.eup %1193 }
 0x19d   :  { %v285_v5 = vmul.f32 %v1194_v4, %v283_v59  ;;  %v267_v7 = vadd.f32 %v1192_v60, %v266_v2  ;;  %vm290_vm8 = vweird.f32 %v1194_v4 }
 0x19e   :  { %vm291_vm10 = vmor %vm289_vm9, %vm290_vm8 }
 0x19f   :  { %v286_v9 = vsub.f32 1.0, %v285_v5  ;;  %v271_v10 = vsel %vm270_vm6, %v1192_v60, %v267_v7 }
 0x1a0   :  { %v276_v11 = vsel %vm273_vm7, %v275_v8, %v271_v10  ;;  %v414_v8 = vld [vmem:[#allocation4 + $0x1] sm:$0x1] }
 0x1a1   :  { %v287_v12 = vmul.f32 %v1194_v4, %v286_v9  ;;  %v300_v14 = vmul.f32 %v276_v11, %v255_v6 }
 0x1a3   :  { %v288_v17 = vadd.f32 %v1194_v4, %v287_v12  ;;  %v301_v18 = vadd.f32 %v300_v14, %v299_v16 }
 0x1a5   :  { %v292_v20 = vsel %vm291_vm10, %v1194_v4, %v288_v17  ;;  %1195 = vtanh.f32 %v301_v18 }
 0x1a6   :  { %v297_v21 = vsel %vm294_vm11, %v296_v19, %v292_v20  ;;  %v507_v19 = vld [vmem:[#allocation3 + $0x2] sm:$0x1] }
 0x1a7   :  { %v303_v22 = vsub.f32 1.0, %v297_v21  ;;  %v305_v25 = vmul.f32 0.0, %v297_v21 }
 0x1ab   :  { %v1196_v23 = vpop.eup %1195 }
 0x1ac   :  { %v304_v24 = vmul.f32 %v1196_v23, %v303_v22  ;;  %v486_v23 = vld [vmem:[#allocation2 + $0x2] sm:$0x1] }
 0x1ae   :  { %v1512_v38 = vadd.f32 %v305_v25, %v304_v24 }
 0x1b0   :  { %308 = vst.msk [vmem:[#allocation8] sm:$0x1] %vm307_vm12, %v1512_v38  ;;  %1142 = vmatmul.msk.f32.vlgmr.msrb.gmra.mxu0 %vm92_vm3, %v1512_v38  ;;  %1143 = vmatmul.msk.f32.vlgmr.msra.gmra.mxu1 %vm92_vm3, %v1512_v38 }
 0x1b1   :  { %1144 = vmatmul.msk.f32.vlgmr.msra.gmra.mxu2 %vm92_vm3, %v1512_v38  ;;  %592 = vmatpush.msrb.mxu0 %v1450_v34 }
 0x1b2   :  { %666 = vmatpush.msra.mxu1 %v1423_v26  ;;  %686 = vmatpush.msra.mxu2 %v1425_v27 }
 0x1b3   :  { %593 = vmatpush.msrb.mxu0 %v1452_v35 }
 0x1b4   :  { %667 = vmatpush.msra.mxu1 %v1427_v28  ;;  %687 = vmatpush.msra.mxu2 %v1431_v29 }
 0x1b5   :  { %594 = vmatpush.msrb.mxu0 %v1456_v36 }
 0x1b6   :  { %668 = vmatpush.msra.mxu1 %v1433_v30  ;;  %688 = vmatpush.msra.mxu2 %v1435_v31 }
 0x1b7   :  { %595 = vmatpush.msrb.mxu0 %v1460_v37 }
 0x1b8   :  { %669 = vmatpush.msra.mxu1 %v1440_v32  ;;  %689 = vmatpush.msra.mxu2 %v1442_v33 }
 0x22d   :  { %v329_v39 = vpop.f32.mrf.mxu0  ;;  %v349_v41 = vpop.f32.mrf.mxu1 }
 0x22e   :  { %v373_v43 = vadd.f32 %v372_v40, %v329_v39  ;;  %v394_v44 = vadd.f32 %v393_v42, %v349_v41 }
 0x230   :  { %v1145_v45 = vmul.f32 -1.442695, %v373_v43  ;;  %v1146_v46 = vmul.f32 -1.442695, %v394_v44 }
 0x232   :  { %1197 = vpow2.f32 %v1145_v45 }
 0x233   :  { %1199 = vpow2.f32 %v1146_v46 }
 0x234   :  { %v369_v61 = vpop.f32.mrf.mxu2 }
 0x235   :  { %v370_v1 = vadd.f32 %v369_v61, %v1509_v63 }
 0x238   :  { %v1198_v47 = vpop.eup %1197 }
 0x239   :  { %v1200_v48 = vpop.eup %1199  ;;  %v377_v49 = vadd.f32 1.0, %v1198_v47 }
 0x23a   :  { %v398_v50 = vadd.f32 1.0, %v1200_v48 }
 0x23b   :  { %1201 = vrcp.f32 %v377_v49  ;;  %v389_v57 = vand.u32 2147483648, %v377_v49  ;;  %v387_v59 = vand.u32 2147483647, %v377_v49  ;;  %vm383_vm14 = vweird.f32 %v377_v49 }
 0x23c   :  { %1203 = vrcp.f32 %v398_v50  ;;  %v410_v5 = vand.u32 2147483648, %v398_v50  ;;  %vm404_vm2 = vweird.f32 %v398_v50  ;;  %v408_v7 = vand.u32 2147483647, %v398_v50 }
 0x23d   :  { %v390_v0 = vor.u32 1.1754944e-38, %v389_v57  ;;  %vm388_vm0 = vcmp.eq.f32.partialorder %v387_v59, 8.507059e+37 }
 0x23e   :  { %v411_v11 = vor.u32 1.1754944e-38, %v410_v5  ;;  %vm409_vm5 = vcmp.eq.f32.partialorder %v408_v7, 8.507059e+37 }
 0x241   :  { %v1202_v51 = vpop.eup %1201 }
 0x242   :  { %v1204_v52 = vpop.eup %1203  ;;  %v379_v53 = vmul.f32 %v1202_v51, %v377_v49  ;;  %vm384_vm13 = vweird.f32 %v1202_v51 }
 0x243   :  { %v400_v54 = vmul.f32 %v1204_v52, %v398_v50  ;;  %vm385_vm15 = vmor %vm383_vm14, %vm384_vm13  ;;  %vm405_vm1 = vweird.f32 %v1204_v52 }
 0x244   :  { %v380_v55 = vsub.f32 1.0, %v379_v53  ;;  %vm406_vm4 = vmor %vm404_vm2, %vm405_vm1 }
 0x245   :  { %v401_v56 = vsub.f32 1.0, %v400_v54 }
 0x246   :  { %v381_v58 = vmul.f32 %v1202_v51, %v380_v55 }
 0x247   :  { %v402_v60 = vmul.f32 %v1204_v52, %v401_v56 }
 0x248   :  { %v382_v62 = vadd.f32 %v1202_v51, %v381_v58 }
 0x249   :  { %v403_v3 = vadd.f32 %v1204_v52, %v402_v60 }
 0x24a   :  { %v386_v2 = vsel %vm385_vm15, %v1202_v51, %v382_v62  ;;  %v528_v62 = vld [vmem:[#allocation4 + $0x2] sm:$0x1] }
 0x24b   :  { %v391_v4 = vsel %vm388_vm0, %v390_v0, %v386_v2  ;;  %v407_v10 = vsel %vm406_vm4, %v1204_v52, %v403_v3 }
 0x24c   :  { %v415_v6 = vmul.f32 %v391_v4, %v370_v1  ;;  %v412_v12 = vsel %vm409_vm5, %v411_v11, %v407_v10  ;;  %v600_v10 = vld [vmem:[#allocation2 + $0x3] sm:$0x1] }
 0x24d   :  { %v418_v13 = vsub.f32 1.0, %v412_v12  ;;  %v420_v16 = vmul.f32 %v412_v12, %v1512_v38  ;;  %v621_v12 = vld [vmem:[#allocation3 + $0x3] sm:$0x1] }
 0x24e   :  { %v416_v9 = vadd.f32 %v415_v6, %v414_v8 }
 0x250   :  { %1205 = vtanh.f32 %v416_v9 }
 0x256   :  { %v1206_v14 = vpop.eup %1205 }
 0x257   :  { %v419_v15 = vmul.f32 %v1206_v14, %v418_v13 }
 0x259   :  { %v1536_v17 = vadd.f32 %v420_v16, %v419_v15 }
 0x25b   :  { %422 = vst.msk [vmem:[#allocation8 + $0x1] sm:$0x1] %vm307_vm12, %v1536_v17  ;;  %1147 = vmatmul.msk.f32.vlgmr.msra.gmra.mxu3 %vm92_vm3, %v1536_v17  ;;  %1148 = vmatmul.msk.f32.vlgmr.msra.gmra.mxu0 %vm92_vm3, %v1536_v17 }
 0x25c   :  { %1149 = vmatmul.msk.f32.vlgmr.msrb.gmra.mxu1 %vm92_vm3, %v1536_v17  ;;  %706 = vmatpush.msra.mxu3 %v1450_v34 }
 0x25d   :  { %780 = vmatpush.msra.mxu0 %v1423_v26  ;;  %800 = vmatpush.msrb.mxu1 %v1425_v27 }
 0x25e   :  { %707 = vmatpush.msra.mxu3 %v1452_v35 }
 0x25f   :  { %781 = vmatpush.msra.mxu0 %v1427_v28  ;;  %801 = vmatpush.msrb.mxu1 %v1431_v29 }
 0x260   :  { %708 = vmatpush.msra.mxu3 %v1456_v36 }
 0x261   :  { %782 = vmatpush.msra.mxu0 %v1433_v30  ;;  %802 = vmatpush.msrb.mxu1 %v1435_v31 }
 0x262   :  { %709 = vmatpush.msra.mxu3 %v1460_v37 }
 0x263   :  { %783 = vmatpush.msra.mxu0 %v1440_v32  ;;  %803 = vmatpush.msrb.mxu1 %v1442_v33 }
 0x2d8   :  { %v463_v18 = vpop.f32.mrf.mxu0 }
 0x2d9   :  { %v508_v20 = vadd.f32 %v507_v19, %v463_v18  ;;  %v483_v52 = vpop.f32.mrf.mxu1 }
 0x2da   :  { %v484_v55 = vadd.f32 %v483_v52, %v1509_v63 }
 0x2db   :  { %v1151_v21 = vmul.f32 -1.442695, %v508_v20 }
 0x2dd   :  { %1207 = vpow2.f32 %v1151_v21 }
 0x2de   :  { %v443_v22 = vpop.f32.mrf.mxu3 }
 0x2df   :  { %v487_v24 = vadd.f32 %v486_v23, %v443_v22 }
 0x2e1   :  { %v1150_v25 = vmul.f32 -1.442695, %v487_v24 }
 0x2e3   :  { %v1208_v38 = vpop.eup %1207  ;;  %1209 = vpow2.f32 %v1150_v25 }
 0x2e4   :  { %v512_v39 = vadd.f32 1.0, %v1208_v38 }
 0x2e6   :  { %1211 = vrcp.f32 %v512_v39  ;;  %v524_v59 = vand.u32 2147483648, %v512_v39  ;;  %vm518_vm11 = vweird.f32 %v512_v39  ;;  %v522_v61 = vand.u32 2147483647, %v512_v39 }
 0x2e8   :  { %v525_v2 = vor.u32 1.1754944e-38, %v524_v59  ;;  %vm523_vm14 = vcmp.eq.f32.partialorder %v522_v61, 8.507059e+37 }
 0x2e9   :  { %v1210_v40 = vpop.eup %1209 }
 0x2ea   :  { %v491_v41 = vadd.f32 1.0, %v1210_v40 }
 0x2ec   :  { %1213 = vrcp.f32 %v491_v41  ;;  %v1212_v42 = vpop.eup %1211  ;;  %v503_v48 = vand.u32 2147483648, %v491_v41  ;;  %v501_v50 = vand.u32 2147483647, %v491_v41  ;;  %vm497_vm7 = vweird.f32 %v491_v41 }
 0x2ed   :  { %v514_v43 = vmul.f32 %v1212_v42, %v512_v39  ;;  %vm519_vm10 = vweird.f32 %v1212_v42 }
 0x2ee   :  { %v504_v54 = vor.u32 1.1754944e-38, %v503_v48  ;;  %vm502_vm9 = vcmp.eq.f32.partialorder %v501_v50, 8.507059e+37  ;;  %vm520_vm13 = vmor %vm518_vm11, %vm519_vm10 }
 0x2ef   :  { %v515_v46 = vsub.f32 1.0, %v514_v43 }
 0x2f1   :  { %v516_v51 = vmul.f32 %v1212_v42, %v515_v46 }
 0x2f2   :  { %v1214_v44 = vpop.eup %1213 }
 0x2f3   :  { %v493_v45 = vmul.f32 %v1214_v44, %v491_v41  ;;  %vm498_vm6 = vweird.f32 %v1214_v44  ;;  %v517_v57 = vadd.f32 %v1212_v42, %v516_v51 }
 0x2f4   :  { %vm499_vm8 = vmor %vm497_vm7, %vm498_vm6 }
 0x2f5   :  { %v494_v47 = vsub.f32 1.0, %v493_v45  ;;  %v521_v1 = vsel %vm520_vm13, %v1212_v42, %v517_v57 }
 0x2f6   :  { %v526_v3 = vsel %vm523_vm14, %v525_v2, %v521_v1  ;;  %v735_v2 = vld [vmem:[#allocation3 + $0x4] sm:$0x1] }
 0x2f7   :  { %v495_v49 = vmul.f32 %v1214_v44, %v494_v47  ;;  %v532_v4 = vsub.f32 1.0, %v526_v3  ;;  %v534_v7 = vmul.f32 %v526_v3, %v1536_v17 }
 0x2f9   :  { %v496_v53 = vadd.f32 %v1214_v44, %v495_v49 }
 0x2fb   :  { %v500_v56 = vsel %vm499_vm8, %v1214_v44, %v496_v53  ;;  %v642_v53 = vld [vmem:[#allocation4 + $0x3] sm:$0x1] }
 0x2fc   :  { %v505_v58 = vsel %vm502_vm9, %v504_v54, %v500_v56 }
 0x2fd   :  { %v529_v60 = vmul.f32 %v505_v58, %v484_v55 }
 0x2ff   :  { %v530_v0 = vadd.f32 %v529_v60, %v528_v62 }
 0x301   :  { %1215 = vtanh.f32 %v530_v0 }
 0x307   :  { %v1216_v5 = vpop.eup %1215 }
 0x308   :  { %v533_v6 = vmul.f32 %v1216_v5, %v532_v4 }
 0x30a   :  { %v1560_v8 = vadd.f32 %v534_v7, %v533_v6 }
 0x30c   :  { %536 = vst.msk [vmem:[#allocation8 + $0x2] sm:$0x1] %vm307_vm12, %v1560_v8  ;;  %1152 = vmatmul.msk.f32.vlgmr.msrb.gmra.mxu2 %vm92_vm3, %v1560_v8  ;;  %1153 = vmatmul.msk.f32.vlgmr.msrb.gmra.mxu3 %vm92_vm3, %v1560_v8 }
 0x30d   :  { %1154 = vmatmul.msk.f32.vlgmr.msrb.gmra.mxu0 %vm92_vm3, %v1560_v8  ;;  %820 = vmatpush.msrb.mxu2 %v1450_v34 }
 0x30e   :  { %894 = vmatpush.msrb.mxu3 %v1423_v26  ;;  %914 = vmatpush.msrb.mxu0 %v1425_v27 }
 0x30f   :  { %821 = vmatpush.msrb.mxu2 %v1452_v35 }
 0x310   :  { %895 = vmatpush.msrb.mxu3 %v1427_v28  ;;  %915 = vmatpush.msrb.mxu0 %v1431_v29 }
 0x311   :  { %822 = vmatpush.msrb.mxu2 %v1456_v36 }
 0x312   :  { %896 = vmatpush.msrb.mxu3 %v1433_v30  ;;  %916 = vmatpush.msrb.mxu0 %v1435_v31 }
 0x313   :  { %823 = vmatpush.msrb.mxu2 %v1460_v37 }
 0x314   :  { %897 = vmatpush.msrb.mxu3 %v1440_v32  ;;  %917 = vmatpush.msrb.mxu0 %v1442_v33 }
 0x38a   :  { %v597_v42 = vpop.f32.mrf.mxu0 }
 0x38b   :  { %v598_v46 = vadd.f32 %v597_v42, %v1509_v63 }
 0x38f   :  { %v557_v9 = vpop.f32.mrf.mxu2  ;;  %v577_v11 = vpop.f32.mrf.mxu3 }
 0x390   :  { %v601_v13 = vadd.f32 %v600_v10, %v557_v9  ;;  %v622_v14 = vadd.f32 %v621_v12, %v577_v11 }
 0x392   :  { %v1155_v15 = vmul.f32 -1.442695, %v601_v13  ;;  %v1156_v16 = vmul.f32 -1.442695, %v622_v14 }
 0x394   :  { %1217 = vpow2.f32 %v1155_v15 }
 0x395   :  { %1219 = vpow2.f32 %v1156_v16 }
 0x39a   :  { %v1218_v17 = vpop.eup %1217 }
 0x39b   :  { %v1220_v18 = vpop.eup %1219  ;;  %v605_v19 = vadd.f32 1.0, %v1218_v17 }
 0x39c   :  { %v626_v20 = vadd.f32 1.0, %v1220_v18 }
 0x39d   :  { %1221 = vrcp.f32 %v605_v19  ;;  %v617_v38 = vand.u32 2147483648, %v605_v19  ;;  %v615_v41 = vand.u32 2147483647, %v605_v19  ;;  %vm611_vm0 = vweird.f32 %v605_v19 }
 0x39e   :  { %1223 = vrcp.f32 %v626_v20  ;;  %v638_v51 = vand.u32 2147483648, %v626_v20  ;;  %vm632_vm5 = vweird.f32 %v626_v20  ;;  %v636_v52 = vand.u32 2147483647, %v626_v20 }
 0x39f   :  { %v618_v45 = vor.u32 1.1754944e-38, %v617_v38  ;;  %vm616_vm2 = vcmp.eq.f32.partialorder %v615_v41, 8.507059e+37 }
 0x3a0   :  { %v639_v56 = vor.u32 1.1754944e-38, %v638_v51  ;;  %vm637_vm7 = vcmp.eq.f32.partialorder %v636_v52, 8.507059e+37 }
 0x3a3   :  { %v1222_v21 = vpop.eup %1221 }
 0x3a4   :  { %v1224_v22 = vpop.eup %1223  ;;  %v607_v23 = vmul.f32 %v1222_v21, %v605_v19  ;;  %vm612_vm15 = vweird.f32 %v1222_v21 }
 0x3a5   :  { %v628_v24 = vmul.f32 %v1224_v22, %v626_v20  ;;  %vm613_vm1 = vmor %vm611_vm0, %vm612_vm15  ;;  %vm633_vm4 = vweird.f32 %v1224_v22 }
 0x3a6   :  { %v608_v25 = vsub.f32 1.0, %v607_v23  ;;  %vm634_vm6 = vmor %vm632_vm5, %vm633_vm4  ;;  %v756_v23 = vld [vmem:[#allocation4 + $0x4] sm:$0x1] }
 0x3a7   :  { %v629_v39 = vsub.f32 1.0, %v628_v24 }
 0x3a8   :  { %v609_v40 = vmul.f32 %v1222_v21, %v608_v25 }
 0x3a9   :  { %v630_v43 = vmul.f32 %v1224_v22, %v629_v39 }
 0x3aa   :  { %v610_v44 = vadd.f32 %v1222_v21, %v609_v40 }
 0x3ab   :  { %v631_v49 = vadd.f32 %v1224_v22, %v630_v43 }
 0x3ac   :  { %v614_v47 = vsel %vm613_vm1, %v1222_v21, %v610_v44 }
 0x3ad   :  { %v619_v48 = vsel %vm616_vm2, %v618_v45, %v614_v47  ;;  %v635_v55 = vsel %vm634_vm6, %v1224_v22, %v631_v49  ;;  %v828_v47 = vld [vmem:[#allocation2 + $0x5] sm:$0x1]  ;;  %v849_v49 = vld [vmem:[#allocation3 + $0x5] sm:$0x1] }
 0x3ae   :  { %v643_v50 = vmul.f32 %v619_v48, %v598_v46  ;;  %v640_v57 = vsel %vm637_vm7, %v639_v56, %v635_v55 }
 0x3af   :  { %v646_v58 = vsub.f32 1.0, %v640_v57  ;;  %v648_v61 = vmul.f32 %v640_v57, %v1560_v8 }
 0x3b0   :  { %v644_v54 = vadd.f32 %v643_v50, %v642_v53 }
 0x3b2   :  { %1225 = vtanh.f32 %v644_v54 }
 0x3b8   :  { %v1226_v59 = vpop.eup %1225 }
 0x3b9   :  { %v647_v60 = vmul.f32 %v1226_v59, %v646_v58 }
 0x3bb   :  { %v1584_v62 = vadd.f32 %v648_v61, %v647_v60 }
 0x3bd   :  { %650 = vst.msk [vmem:[#allocation8 + $0x3] sm:$0x1] %vm307_vm12, %v1584_v62  ;;  %1157 = vmatmul.msk.f32.vlgmr.msra.gmra.mxu1 %vm92_vm3, %v1584_v62  ;;  %1158 = vmatmul.msk.f32.vlgmr.msra.gmra.mxu2 %vm92_vm3, %v1584_v62 }
 0x3be   :  { %1159 = vmatmul.msk.f32.vlgmr.msra.gmra.mxu3 %vm92_vm3, %v1584_v62  ;;  %934 = vmatpush.msra.mxu1 %v1450_v34 }
 0x3bf   :  { %1008 = vmatpush.msra.mxu2 %v1423_v26  ;;  %1028 = vmatpush.msra.mxu3 %v1425_v27  ;;  %v714_v27 = vld [vmem:[#allocation2 + $0x4] sm:$0x1] }
 0x3c0   :  { %935 = vmatpush.msra.mxu1 %v1452_v35 }
 0x3c1   :  { %1009 = vmatpush.msra.mxu2 %v1427_v28  ;;  %1029 = vmatpush.msra.mxu3 %v1431_v29 }
 0x3c2   :  { %936 = vmatpush.msra.mxu1 %v1456_v36 }
 0x3c3   :  { %1010 = vmatpush.msra.mxu2 %v1433_v30  ;;  %1030 = vmatpush.msra.mxu3 %v1435_v31 }
 0x3c4   :  { %937 = vmatpush.msra.mxu1 %v1460_v37 }
 0x3c5   :  { %1011 = vmatpush.msra.mxu2 %v1440_v32  ;;  %1031 = vmatpush.msra.mxu3 %v1442_v33 }
 0x43a   :  { %v671_v26 = vpop.f32.mrf.mxu1 }
 0x43b   :  { %v715_v0 = vadd.f32 %v714_v27, %v671_v26 }
 0x43d   :  { %v1160_v1 = vmul.f32 -1.442695, %v715_v0 }
 0x43f   :  { %1227 = vpow2.f32 %v1160_v1 }
 0x440   :  { %v691_v28 = vpop.f32.mrf.mxu2 }
 0x441   :  { %v736_v29 = vadd.f32 %v735_v2, %v691_v28  ;;  %v711_v11 = vpop.f32.mrf.mxu3 }
 0x442   :  { %v712_v16 = vadd.f32 %v711_v11, %v1509_v63 }
 0x443   :  { %v1161_v3 = vmul.f32 -1.442695, %v736_v29 }
 0x445   :  { %v1228_v4 = vpop.eup %1227  ;;  %1229 = vpow2.f32 %v1161_v3 }
 0x446   :  { %v719_v30 = vadd.f32 1.0, %v1228_v4 }
 0x448   :  { %1231 = vrcp.f32 %v719_v30  ;;  %v731_v33 = vand.u32 2147483648, %v719_v30  ;;  %v729_v9 = vand.u32 2147483647, %v719_v30  ;;  %vm725_vm9 = vweird.f32 %v719_v30 }
 0x44a   :  { %v732_v14 = vor.u32 1.1754944e-38, %v731_v33  ;;  %vm730_vm11 = vcmp.eq.f32.partialorder %v729_v9, 8.507059e+37 }
 0x44b   :  { %v1230_v31 = vpop.eup %1229 }
 0x44c   :  { %v740_v5 = vadd.f32 1.0, %v1230_v31 }
 0x44e   :  { %v1232_v6 = vpop.eup %1231  ;;  %1233 = vrcp.f32 %v740_v5  ;;  %v752_v20 = vand.u32 2147483648, %v740_v5  ;;  %v750_v22 = vand.u32 2147483647, %v740_v5  ;;  %vm746_vm14 = vweird.f32 %v740_v5 }
 0x44f   :  { %v721_v32 = vmul.f32 %v1232_v6, %v719_v30  ;;  %vm726_vm8 = vweird.f32 %v1232_v6 }
 0x450   :  { %vm727_vm10 = vmor %vm725_vm9, %vm726_vm8  ;;  %v753_v38 = vor.u32 1.1754944e-38, %v752_v20  ;;  %vm751_vm0 = vcmp.eq.f32.partialorder %v750_v22, 8.507059e+37 }
 0x451   :  { %v722_v7 = vsub.f32 1.0, %v721_v32 }
 0x453   :  { %v723_v8 = vmul.f32 %v1232_v6, %v722_v7 }
 0x454   :  { %v1234_v10 = vpop.eup %1233 }
 0x455   :  { %v742_v12 = vmul.f32 %v1234_v10, %v740_v5  ;;  %v724_v13 = vadd.f32 %v1232_v6, %v723_v8  ;;  %vm747_vm13 = vweird.f32 %v1234_v10  ;;  %v870_v5 = vld [vmem:[#allocation4 + $0x5] sm:$0x1] }
 0x456   :  { %vm748_vm15 = vmor %vm746_vm14, %vm747_vm13 }
 0x457   :  { %v743_v15 = vsub.f32 1.0, %v742_v12  ;;  %v728_v17 = vsel %vm727_vm10, %v1232_v6, %v724_v13 }
 0x458   :  { %v733_v18 = vsel %vm730_vm11, %v732_v14, %v728_v17  ;;  %v963_v14 = vld [vmem:[#allocation3 + $0x6] sm:$0x1] }
 0x459   :  { %v744_v19 = vmul.f32 %v1234_v10, %v743_v15  ;;  %v757_v21 = vmul.f32 %v733_v18, %v712_v16  ;;  %v942_v18 = vld [vmem:[#allocation2 + $0x6] sm:$0x1] }
 0x45b   :  { %v745_v24 = vadd.f32 %v1234_v10, %v744_v19  ;;  %v758_v25 = vadd.f32 %v757_v21, %v756_v23 }
 0x45d   :  { %v749_v39 = vsel %vm748_vm15, %v1234_v10, %v745_v24  ;;  %1235 = vtanh.f32 %v758_v25 }
 0x45e   :  { %v754_v40 = vsel %vm751_vm0, %v753_v38, %v749_v39 }
 0x45f   :  { %v760_v41 = vsub.f32 1.0, %v754_v40  ;;  %v762_v44 = vmul.f32 %v754_v40, %v1584_v62 }
 0x463   :  { %v1236_v42 = vpop.eup %1235 }
 0x464   :  { %v761_v43 = vmul.f32 %v1236_v42, %v760_v41 }
 0x466   :  { %v763_v45 = vadd.f32 %v762_v44, %v761_v43 }
 0x468   :  { %764 = vst.msk [vmem:[#allocation8 + $0x4] sm:$0x1] %vm307_vm12, %v763_v45  ;;  %1162 = vmatmul.msk.f32.vlgmr.msra.gmra.mxu0 %vm92_vm3, %v763_v45  ;;  %1163 = vmatmul.msk.f32.vlgmr.msrb.gmra.mxu1 %vm92_vm3, %v763_v45 }
 0x469   :  { %1164 = vmatmul.msk.f32.vlgmr.msrb.gmra.mxu2 %vm92_vm3, %v763_v45  ;;  %1048 = vmatpush.msra.mxu0 %v1450_v34 }
 0x46b   :  { %1049 = vmatpush.msra.mxu0 %v1452_v35 }
 0x46d   :  { %1050 = vmatpush.msra.mxu0 %v1456_v36 }
 0x46f   :  { %1051 = vmatpush.msra.mxu0 %v1460_v37 }
 0x4e5   :  { %v785_v46 = vpop.f32.mrf.mxu0  ;;  %v805_v48 = vpop.f32.mrf.mxu1 }
 0x4e6   :  { %v829_v50 = vadd.f32 %v828_v47, %v785_v46  ;;  %v850_v51 = vadd.f32 %v849_v49, %v805_v48 }
 0x4e8   :  { %v1165_v52 = vmul.f32 -1.442695, %v829_v50  ;;  %v1166_v53 = vmul.f32 -1.442695, %v850_v51 }
 0x4ea   :  { %1237 = vpow2.f32 %v1165_v52 }
 0x4eb   :  { %1239 = vpow2.f32 %v1166_v53 }
 0x4ec   :  { %v825_v27 = vpop.f32.mrf.mxu2 }
 0x4ed   :  { %v826_v28 = vadd.f32 %v825_v27, %v1509_v63  ;;  %v1056_v27 = vld [vmem:[#allocation2 + $0x7] sm:$0x1] }
 0x4f0   :  { %v1238_v54 = vpop.eup %1237 }
 0x4f1   :  { %v1240_v55 = vpop.eup %1239  ;;  %v833_v56 = vadd.f32 1.0, %v1238_v54 }
 0x4f2   :  { %v854_v34 = vadd.f32 1.0, %v1240_v55 }
 0x4f3   :  { %1241 = vrcp.f32 %v833_v56  ;;  %v845_v60 = vand.u32 2147483648, %v833_v56  ;;  %v843_v62 = vand.u32 2147483647, %v833_v56  ;;  %vm839_vm2 = vweird.f32 %v833_v56 }
 0x4f4   :  { %1243 = vrcp.f32 %v854_v34  ;;  %v866_v4 = vand.u32 2147483648, %v854_v34  ;;  %vm860_vm7 = vweird.f32 %v854_v34  ;;  %v864_v31 = vand.u32 2147483647, %v854_v34 }
 0x4f5   :  { %v846_v1 = vor.u32 1.1754944e-38, %v845_v60  ;;  %vm844_vm5 = vcmp.eq.f32.partialorder %v843_v62, 8.507059e+37 }
 0x4f6   :  { %v867_v7 = vor.u32 1.1754944e-38, %v866_v4  ;;  %vm865_vm9 = vcmp.eq.f32.partialorder %v864_v31, 8.507059e+37 }
 0x4f9   :  { %v1242_v35 = vpop.eup %1241 }
 0x4fa   :  { %v1244_v36 = vpop.eup %1243  ;;  %v835_v57 = vmul.f32 %v1242_v35, %v833_v56  ;;  %vm840_vm1 = vweird.f32 %v1242_v35 }
 0x4fb   :  { %v856_v37 = vmul.f32 %v1244_v36, %v854_v34  ;;  %vm841_vm4 = vmor %vm839_vm2, %vm840_vm1  ;;  %vm861_vm6 = vweird.f32 %v1244_v36  ;;  %v984_v34 = vld [vmem:[#allocation4 + $0x6] sm:$0x1] }
 0x4fc   :  { %v836_v58 = vsub.f32 1.0, %v835_v57  ;;  %vm862_vm8 = vmor %vm860_vm7, %vm861_vm6 }
 0x4fd   :  { %v857_v59 = vsub.f32 1.0, %v856_v37 }
 0x4fe   :  { %v837_v61 = vmul.f32 %v1242_v35, %v836_v58 }
 0x4ff   :  { %v858_v26 = vmul.f32 %v1244_v36, %v857_v59 }
 0x500   :  { %v838_v0 = vadd.f32 %v1242_v35, %v837_v61 }
 0x501   :  { %v859_v29 = vadd.f32 %v1244_v36, %v858_v26 }
 0x502   :  { %v842_v2 = vsel %vm841_vm4, %v1242_v35, %v838_v0 }
 0x503   :  { %v847_v3 = vsel %vm844_vm5, %v846_v1, %v842_v2  ;;  %v863_v32 = vsel %vm862_vm8, %v1244_v36, %v859_v29  ;;  %v1077_v1 = vld [vmem:[#allocation3 + $0x7] sm:$0x1] }
 0x504   :  { %v871_v30 = vmul.f32 %v847_v3, %v826_v28  ;;  %v868_v33 = vsel %vm865_vm9, %v867_v7, %v863_v32 }
 0x505   :  { %v874_v8 = vsub.f32 1.0, %v868_v33  ;;  %v876_v11 = vmul.f32 %v868_v33, %v763_v45 }
 0x506   :  { %v872_v6 = vadd.f32 %v871_v30, %v870_v5 }
 0x508   :  { %1245 = vtanh.f32 %v872_v6 }
 0x50e   :  { %v1246_v9 = vpop.eup %1245 }
 0x50f   :  { %v875_v10 = vmul.f32 %v1246_v9, %v874_v8 }
 0x511   :  { %v877_v12 = vadd.f32 %v876_v11, %v875_v10 }
 0x513   :  { %878 = vst.msk [vmem:[#allocation8 + $0x5] sm:$0x1] %vm307_vm12, %v877_v12  ;;  %1167 = vmatmul.msk.f32.vlgmr.msrb.gmra.mxu3 %vm92_vm3, %v877_v12  ;;  %1168 = vmatmul.msk.f32.vlgmr.msrb.gmra.mxu0 %vm92_vm3, %v877_v12 }
 0x514   :  { %1169 = vmatmul.msk.f32.vlgmr.msra.gmra.mxu1 %vm92_vm3, %v877_v12 }
 0x590   :  { %v919_v13 = vpop.f32.mrf.mxu0 }
 0x591   :  { %v964_v15 = vadd.f32 %v963_v14, %v919_v13  ;;  %v939_v47 = vpop.f32.mrf.mxu1 }
 0x592   :  { %v940_v50 = vadd.f32 %v939_v47, %v1509_v63 }
 0x593   :  { %v1171_v16 = vmul.f32 -1.442695, %v964_v15 }
 0x595   :  { %1247 = vpow2.f32 %v1171_v16 }
 0x596   :  { %v899_v17 = vpop.f32.mrf.mxu3 }
 0x597   :  { %v943_v19 = vadd.f32 %v942_v18, %v899_v17 }
 0x599   :  { %v1170_v20 = vmul.f32 -1.442695, %v943_v19 }
 0x59b   :  { %v1248_v21 = vpop.eup %1247  ;;  %1249 = vpow2.f32 %v1170_v20 }
 0x59c   :  { %v968_v22 = vadd.f32 1.0, %v1248_v21 }
 0x59e   :  { %1251 = vrcp.f32 %v968_v22  ;;  %v980_v54 = vand.u32 2147483648, %v968_v22  ;;  %vm974_vm0 = vweird.f32 %v968_v22  ;;  %v978_v56 = vand.u32 2147483647, %v968_v22 }
 0x5a0   :  { %v981_v57 = vor.u32 1.1754944e-38, %v980_v54  ;;  %vm979_vm2 = vcmp.eq.f32.partialorder %v978_v56, 8.507059e+37 }
 0x5a1   :  { %v1250_v23 = vpop.eup %1249 }
 0x5a2   :  { %v947_v24 = vadd.f32 1.0, %v1250_v23  ;;  %v1098_v23 = vld [vmem:[#allocation4 + $0x7] sm:$0x1] }
 0x5a4   :  { %1253 = vrcp.f32 %v947_v24  ;;  %v1252_v25 = vpop.eup %1251  ;;  %v959_v43 = vand.u32 2147483648, %v947_v24  ;;  %v957_v45 = vand.u32 2147483647, %v947_v24  ;;  %vm953_vm11 = vweird.f32 %v947_v24 }
 0x5a5   :  { %v970_v38 = vmul.f32 %v1252_v25, %v968_v22  ;;  %vm975_vm15 = vweird.f32 %v1252_v25 }
 0x5a6   :  { %v960_v49 = vor.u32 1.1754944e-38, %v959_v43  ;;  %vm958_vm14 = vcmp.eq.f32.partialorder %v957_v45, 8.507059e+37  ;;  %vm976_vm1 = vmor %vm974_vm0, %vm975_vm15 }
 0x5a7   :  { %v971_v41 = vsub.f32 1.0, %v970_v38 }
 0x5a9   :  { %v972_v46 = vmul.f32 %v1252_v25, %v971_v41 }
 0x5aa   :  { %v1254_v39 = vpop.eup %1253 }
 0x5ab   :  { %v949_v40 = vmul.f32 %v1254_v39, %v947_v24  ;;  %vm954_vm10 = vweird.f32 %v1254_v39  ;;  %v973_v52 = vadd.f32 %v1252_v25, %v972_v46 }
 0x5ac   :  { %vm955_vm13 = vmor %vm953_vm11, %vm954_vm10 }
 0x5ad   :  { %v950_v42 = vsub.f32 1.0, %v949_v40  ;;  %v977_v36 = vsel %vm976_vm1, %v1252_v25, %v973_v52 }
 0x5ae   :  { %v982_v37 = vsel %vm979_vm2, %v981_v57, %v977_v36 }
 0x5af   :  { %v951_v44 = vmul.f32 %v1254_v39, %v950_v42  ;;  %v988_v58 = vsub.f32 1.0, %v982_v37  ;;  %v990_v61 = vmul.f32 %v982_v37, %v877_v12 }
 0x5b1   :  { %v952_v48 = vadd.f32 %v1254_v39, %v951_v44 }
 0x5b3   :  { %v956_v51 = vsel %vm955_vm13, %v1254_v39, %v952_v48 }
 0x5b4   :  { %v961_v53 = vsel %vm958_vm14, %v960_v49, %v956_v51 }
 0x5b5   :  { %v985_v55 = vmul.f32 %v961_v53, %v940_v50 }
 0x5b7   :  { %v986_v35 = vadd.f32 %v985_v55, %v984_v34 }
 0x5b9   :  { %1255 = vtanh.f32 %v986_v35 }
 0x5bf   :  { %v1256_v59 = vpop.eup %1255 }
 0x5c0   :  { %v989_v60 = vmul.f32 %v1256_v59, %v988_v58 }
 0x5c2   :  { %v991_v62 = vadd.f32 %v990_v61, %v989_v60 }
 0x5c4   :  { %992 = vst.msk [vmem:[#allocation8 + $0x6] sm:$0x1] %vm307_vm12, %v991_v62  ;;  %1172 = vmatmul.msk.f32.vlgmr.msra.gmra.mxu2 %vm92_vm3, %v991_v62  ;;  %1173 = vmatmul.msk.f32.vlgmr.msra.gmra.mxu3 %vm92_vm3, %v991_v62 }
 0x5c5   :  { %1174 = vmatmul.msk.f32.vlgmr.msra.gmra.mxu0 %vm92_vm3, %v991_v62 }
 0x642   :  { %v1053_v13 = vpop.f32.mrf.mxu0 }
 0x643   :  { %v1054_v17 = vadd.f32 %v1053_v13, %v1509_v63 }
 0x647   :  { %v1013_v26 = vpop.f32.mrf.mxu2  ;;  %v1033_v0 = vpop.f32.mrf.mxu3 }
 0x648   :  { %v1057_v28 = vadd.f32 %v1056_v27, %v1013_v26  ;;  %v1078_v2 = vadd.f32 %v1077_v1, %v1033_v0 }
 0x64a   :  { %v1175_v29 = vmul.f32 -1.442695, %v1057_v28  ;;  %v1176_v3 = vmul.f32 -1.442695, %v1078_v2 }
 0x64c   :  { %1257 = vpow2.f32 %v1175_v29 }
 0x64d   :  { %1259 = vpow2.f32 %v1176_v3 }
 0x652   :  { %v1258_v4 = vpop.eup %1257 }
 0x653   :  { %v1260_v30 = vpop.eup %1259  ;;  %v1061_v31 = vadd.f32 1.0, %v1258_v4 }
 0x654   :  { %v1082_v5 = vadd.f32 1.0, %v1260_v30 }
 0x655   :  { %1261 = vrcp.f32 %v1061_v31  ;;  %v1073_v9 = vand.u32 2147483648, %v1061_v31  ;;  %v1071_v12 = vand.u32 2147483647, %v1061_v31  ;;  %vm1067_vm4 = vweird.f32 %v1061_v31 }
 0x656   :  { %1263 = vrcp.f32 %v1082_v5  ;;  %v1094_v22 = vand.u32 2147483648, %v1082_v5  ;;  %vm1088_vm8 = vweird.f32 %v1082_v5  ;;  %v1092_v24 = vand.u32 2147483647, %v1082_v5 }
 0x657   :  { %v1074_v16 = vor.u32 1.1754944e-38, %v1073_v9  ;;  %vm1072_vm6 = vcmp.eq.f32.partialorder %v1071_v12, 8.507059e+37 }
 0x658   :  { %v1095_v39 = vor.u32 1.1754944e-38, %v1094_v22  ;;  %vm1093_vm10 = vcmp.eq.f32.partialorder %v1092_v24, 8.507059e+37 }
 0x65b   :  { %v1262_v6 = vpop.eup %1261 }
 0x65c   :  { %v1264_v32 = vpop.eup %1263  ;;  %v1063_v7 = vmul.f32 %v1262_v6, %v1061_v31  ;;  %vm1068_vm3 = vweird.f32 %v1262_v6 }
 0x65d   :  { %v1084_v33 = vmul.f32 %v1264_v32, %v1082_v5  ;;  %vm1069_vm5 = vmor %vm1067_vm4, %vm1068_vm3  ;;  %vm1089_vm7 = vweird.f32 %v1264_v32 }
 0x65e   :  { %v1064_v8 = vsub.f32 1.0, %v1063_v7  ;;  %vm1090_vm9 = vmor %vm1088_vm8, %vm1089_vm7 }
 0x65f   :  { %v1085_v10 = vsub.f32 1.0, %v1084_v33 }
 0x660   :  { %v1065_v11 = vmul.f32 %v1262_v6, %v1064_v8 }
 0x661   :  { %v1086_v14 = vmul.f32 %v1264_v32, %v1085_v10 }
 0x662   :  { %v1066_v15 = vadd.f32 %v1262_v6, %v1065_v11 }
 0x663   :  { %v1087_v20 = vadd.f32 %v1264_v32, %v1086_v14 }
 0x664   :  { %v1070_v18 = vsel %vm1069_vm5, %v1262_v6, %v1066_v15 }
 0x665   :  { %v1075_v19 = vsel %vm1072_vm6, %v1074_v16, %v1070_v18  ;;  %v1091_v38 = vsel %vm1090_vm9, %v1264_v32, %v1087_v20 }
 0x666   :  { %v1099_v21 = vmul.f32 %v1075_v19, %v1054_v17  ;;  %v1096_v40 = vsel %vm1093_vm10, %v1095_v39, %v1091_v38 }
 0x667   :  { %v1102_v41 = vsub.f32 1.0, %v1096_v40  ;;  %v1104_v43 = vmul.f32 %v1096_v40, %v991_v62 }
 0x668   :  { %v1100_v25 = vadd.f32 %v1099_v21, %v1098_v23 }
 0x66a   :  { %1265 = vtanh.f32 %v1100_v25 }
 0x670   :  { %v1266_v42 = vpop.eup %1265 }
 0x671   :  { %v1103_v63 = vmul.f32 %v1266_v42, %v1102_v41 }
 0x673   :  { %v1105_v44 = vadd.f32 %v1104_v43, %v1103_v63 }
 0x675   :  { %1106 = vst.msk [vmem:[#allocation8 + $0x7] sm:$0x1] %vm307_vm12, %v1105_v44 }
 0x676   :  { %1117 = dma.vmem_to_hbm [thread:$0]  %s1113_s21, 128, %s1115_s24, [#allocation7]  }
 0x677   :  { %1317 = dma.done.wait [#allocation7], 128  }
 0x678   :  { %1318 = vsyncadd [#allocation7], 4294967168 }
 0x679   :  { %1122 = vsyncpa [#allocation6], 1 }
 0x67a   :  { %1123 = vsyncpa [#allocation7], 1 }

</bundles_post_ra>
